<compile_context>
chip_gen: v6e
topology: v6e:2x2x1
jax: 0.10.0
libtpu: 0.0.40
codegen_flags: <defaults>
</compile_context>

<pallas_src>
import numpy as np
import jax
import jax.numpy as jnp
from jax.experimental import pallas as pl
from jax.experimental.pallas import tpu as pltpu


# ----------------------------------------------------------------------------
# Fused Pallas kernel (single launch, single grid step)
# ----------------------------------------------------------------------------

def _synthesis_block_kernel(ws0_ref, ws1_ref, a1t_ref, b1a_ref, argbt_ref,
                            brgba_ref, wsqt_ref, selmask_ref, expand_ref,
                            extra_ref, w1_ref, patches_ref, mrgb_ref, brgb_ref,
                            xout_ref, img_ref):
    f32 = jnp.float32
    B = ws0_ref.shape[0]
    C = a1t_ref.shape[1]

    # Affine style layers (FullyConnectedLayer); weight gains folded into
    # a1t / argbt at prep time.
    s1 = jnp.dot(ws0_ref[...], a1t_ref[...], preferred_element_type=f32) + b1a_ref[...]
    srgb = jnp.dot(ws1_ref[...], argbt_ref[...], preferred_element_type=f32) + brgba_ref[...]

    # [B, C] -> [B*C, C]: row b*C + co carries the batch-b style vector.
    # (sublane broadcast + sublane concat at 16-row boundaries: layout clean)
    def stack_rows(m):
        return jnp.concatenate(
            [jnp.broadcast_to(m[b:b + 1, :], (C, C)) for b in range(B)], axis=0)

    s1_stack = stack_rows(s1)
    srgb_stack = stack_rows(srgb)

    # Demodulation coefficient d[b, co] directly as a lane-dense column [B*C, 1].
    d_col = jax.lax.rsqrt(
        jnp.sum(s1_stack * s1_stack * wsqt_ref[...], axis=1, keepdims=True) + 1e-8)
    # torgb style s_rgb[b, c] as a column (diagonal pick via tiled-eye mask).
    srgb_col = jnp.sum(srgb_stack * selmask_ref[...], axis=1, keepdims=True)

    # Stacked modulated + demodulated conv1 weight [B*C, CKp]; the bias/noise
    # pad columns stay at exactly 1.0 (extra_row) so they are NOT demodulated.
    smod = (jnp.dot(s1_stack, expand_ref[...], preferred_element_type=f32) * d_col
            + extra_ref[...])
    wmod = (w1_ref[...] * smod).astype(jnp.bfloat16)

    # conv1 (3x3x3) + noise + bias as ONE MXU matmul against the shared padded
    # im2col patches (bf16 operands, f32 accumulation), then leaky_relu(0.2).
    conv = jnp.dot(wmod, patches_ref[...], preferred_element_type=f32)   # [B*C, S]
    act = jnp.where(conv >= 0.0, conv, 0.2 * conv)
    xout_ref[...] = act.astype(xout_ref.dtype)

    # torgb: modulate activations per (b, c) row, block-diagonal 1x1x1 conv, + bias.
    act_rgb = (act * srgb_col).astype(jnp.bfloat16)
    rgb = jnp.dot(mrgb_ref[...], act_rgb, preferred_element_type=f32) + brgb_ref[...]
    img_ref[...] = rgb.astype(img_ref.dtype)


# ----------------------------------------------------------------------------
# Parameter preparation (done once; const / weights / batch size are static)
# ----------------------------------------------------------------------------

def prepare_synthesis_block(params, batch_size):
    const = params['const']                       # [C, R, R, R]
    C, R = const.shape[0], const.shape[1]
    w_dim = params['affine1_w'].shape[1]
    imgC = params['torgb_weight'].shape[0]
    B = batch_size
    K = 27
    CK = C * K
    S = R * R * R
    CKp = ((CK + 2 + 127) // 128) * 128           # padded contraction dim (432 -> 512)

    fc_gain = 1.0 / np.sqrt(w_dim)                # FullyConnectedLayer weight_gain
    rgb_gain = 1.0 / np.sqrt(C)                   # OutBlock weight_gain (on styles)

    a1t = (params['affine1_w'] * fc_gain).T.astype(jnp.float32)          # [wd, C]
    b1a = params['affine1_b'].reshape(1, C).astype(jnp.float32)
    argbt = ((params['affine_rgb_w'] * fc_gain).T * rgb_gain).astype(jnp.float32)
    brgba = (params['affine_rgb_b'] * rgb_gain).reshape(1, C).astype(jnp.float32)

    W1 = params['conv1_weight']                                           # [Co, Ci, 3,3,3]
    wsqt = jnp.tile(jnp.sum(W1 * W1, axis=(2, 3, 4)), (B, 1))             # [B*C, Ci]
    selmask = jnp.tile(jnp.eye(C, dtype=jnp.float32), (B, 1))             # [B*C, C]

    expand_pad = np.zeros((C, CKp), np.float32)                           # K-expansion
    expand_pad[:, :CK] = np.repeat(np.eye(C, dtype=np.float32), K, axis=1)
    expand_pad = jnp.asarray(expand_pad)

    extra_row = np.zeros((1, CKp), np.float32)                            # keep pad cols un-demodulated
    extra_row[0, CK] = 1.0        # bias column
    extra_row[0, CK + 1] = 1.0    # noise column
    extra_row = jnp.asarray(extra_row)

    w1pad = jnp.zeros((C, CKp), jnp.float32)
    w1pad = w1pad.at[:, :CK].set(W1.reshape(C, CK))                       # ci-major, k-minor
    w1pad = w1pad.at[:, CK].set(params['conv1_bias'])                     # bias column
    w1pad = w1pad.at[:, CK + 1].set(1.0)                                  # noise multiplier
    w1_tiled = jnp.tile(w1pad, (B, 1))                                    # [B*C, CKp]

    # im2col of the constant input, transposed & lane-dense: [CKp, S], shared by
    # all batch elements (x = broadcast(const)).  Pad rows carry ones (bias) and
    # the (noise_const * noise_strength) plane broadcast over depth & channels.
    xp = jnp.pad(const, ((0, 0), (1, 1), (1, 1), (1, 1)))
    cols = []
    for kd in range(3):
        for kh in range(3):
            for kw in range(3):
                cols.append(xp[:, kd:kd + R, kh:kh + R, kw:kw + R].reshape(C, S))
    patches = jnp.stack(cols, axis=1).reshape(CK, S)

    noise2d = params['noise_const'] * params['noise_strength']            # [R, R]
    noise_row = jnp.broadcast_to(noise2d[None, :, :], (R, R, R)).reshape(S)

    patches_pad = jnp.zeros((CKp, S), jnp.float32)
    patches_pad = patches_pad.at[:CK].set(patches)
    patches_pad = patches_pad.at[CK].set(1.0)
    patches_pad = patches_pad.at[CK + 1].set(noise_row)
    patches_pad = patches_pad.astype(jnp.bfloat16)

    wrgb = params['torgb_weight'].reshape(imgC, C).astype(jnp.float32)
    mrgb = jnp.kron(jnp.eye(B, dtype=jnp.float32), wrgb).astype(jnp.bfloat16)   # block-diag
    brgb_ostack = jnp.tile(params['torgb_bias'].reshape(imgC, 1).astype(jnp.float32), (B, 1))

    return dict(B=B, C=C, R=R, S=S, CK=CK, CKp=CKp, imgC=imgC, w_dim=w_dim,
                a1t=a1t, b1a=b1a, argbt=argbt, brgba=brgba,
                wsqt=wsqt, selmask=selmask, expand_pad=expand_pad,
                extra_row=extra_row, w1_tiled=w1_tiled,
                patches_pad=patches_pad, mrgb=mrgb, brgb_ostack=brgb_ostack)


# ----------------------------------------------------------------------------
# SynthesisBlock forward (wrapper) — ONE pallas_call launch total
# ----------------------------------------------------------------------------

def synthesis_block_apply(prep, ws):
    B, C, R, S = prep['B'], prep['C'], prep['R'], prep['S']
    CKp, imgC, w_dim = prep['CKp'], prep['imgC'], prep['w_dim']
    assert ws.shape[0] == B and ws.shape[1] >= 2

    ws0 = ws[:, 0]                                # styles for conv1
    ws1 = ws[:, 1]                                # styles for torgb

    def full(shape):
        return pl.BlockSpec(shape, lambda i, _s=shape: (0,) * len(_s))

    x_flat, img_flat = pl.pallas_call(
        _synthesis_block_kernel,
        out_shape=(jax.ShapeDtypeStruct((B * C, S), jnp.float32),
                   jax.ShapeDtypeStruct((B * imgC, S), jnp.float32)),
        grid=(1,),
        in_specs=[full((B, w_dim)), full((B, w_dim)),
                  full((w_dim, C)), full((1, C)),
                  full((w_dim, C)), full((1, C)),
                  full((B * C, C)), full((B * C, C)),
                  full((C, CKp)), full((1, CKp)),
                  full((B * C, CKp)), full((CKp, S)),
                  full((B * imgC, B * C)), full((B * imgC, 1))],
        out_specs=(full((B * C, S)), full((B * imgC, S))),
        compiler_params=pltpu.CompilerParams(dimension_semantics=("arbitrary",)),
    )(ws0, ws1, prep['a1t'], prep['b1a'], prep['argbt'], prep['brgba'],
      prep['wsqt'], prep['selmask'], prep['expand_pad'], prep['extra_row'],
      prep['w1_tiled'], prep['patches_pad'], prep['mrgb'], prep['brgb_ostack'])

    # [B*C, S] / [B*imgC, S] are already NCDHW-flat: pure (metadata-only) reshape.
    return (x_flat.reshape(B, C, R, R, R),
            img_flat.reshape(B, imgC, R, R, R))


# ----------------------------------------------------------------------------
# Pure-JAX reference (mirrors the PyTorch code, NCDHW) for verification
# ----------------------------------------------------------------------------

def reference_forward(params, ws):
    hp = jax.lax.Precision.HIGHEST
    B = ws.shape[0]
    w_dim = ws.shape[-1]
    C, R = params['const'].shape[0], params['const'].shape[1]
    imgC = params['torgb_weight'].shape[0]

    x = jnp.broadcast_to(params['const'][None], (B, C, R, R, R))
    styles1 = jnp.matmul(ws[:, 0], (params['affine1_w'] / np.sqrt(w_dim)).T,
                         precision=hp) + params['affine1_b']
    styles_rgb = (jnp.matmul(ws[:, 1], (params['affine_rgb_w'] / np.sqrt(w_dim)).T,
                             precision=hp) + params['affine_rgb_b']) / np.sqrt(C)

    W1 = params['conv1_weight']
    wmod = W1[None] * styles1[:, None, :, None, None, None]
    d = jax.lax.rsqrt(jnp.sum(wmod * wmod, axis=(2, 3, 4, 5)) + 1e-8)
    wmod = wmod * d[:, :, None, None, None, None]

    outs = []
    for b in range(B):
        y = jax.lax.conv_general_dilated(
            x[b:b + 1], wmod[b], window_strides=(1, 1, 1), padding='SAME',
            dimension_numbers=('NCDHW', 'OIDHW', 'NCDHW'), precision=hp)
        outs.append(y[0])
    conv = jnp.stack(outs)
    conv = conv + params['noise_const'] * params['noise_strength']   # [R,R] broadcast
    conv = conv + params['conv1_bias'][None, :, None, None, None]
    act = jnp.where(conv >= 0, conv, 0.2 * conv)

    wrgb = params['torgb_weight'].reshape(imgC, C)
    rgb = jnp.einsum('bcdhw,oc,bc->bodhw', act, wrgb, styles_rgb, precision=hp)
    rgb = rgb + params['torgb_bias'][None, :, None, None, None]
    return act, rgb


# ----------------------------------------------------------------------------

if __name__ == "__main__":
    B, C, w_dim, R, imgC = 2, 16, 32, 8, 3
    key = jax.random.PRNGKey(0)
    k = jax.random.split(key, 10)

    params = {
        'const':        jax.random.normal(k[0], (C, R, R, R), jnp.float32),
        'affine1_w':    jax.random.normal(k[1], (C, w_dim), jnp.float32),
        'affine1_b':    jnp.ones((C,), jnp.float32),                  # bias_init=1
        'conv1_weight': jax.random.normal(k[2], (C, C, 3, 3, 3), jnp.float32),
        'conv1_bias':   0.1 * jax.random.normal(k[7], (C,), jnp.float32),
        'noise_const':  jax.random.normal(k[3], (R, R), jnp.float32),
        'noise_strength': jnp.float32(0.3),       # nonzero: validates the noise fold
        'affine_rgb_w': jax.random.normal(k[4], (C, w_dim), jnp.float32),
        'affine_rgb_b': jnp.ones((C,), jnp.float32),                  # bias_init=1
        'torgb_weight': jax.random.normal(k[5], (imgC, C, 1, 1, 1), jnp.float32),
        'torgb_bias':   0.1 * jax.random.normal(k[8], (imgC,), jnp.float32),
    }
    # ws: [B, num_conv + num_torgb = 2, w_dim]
    ws = jax.random.normal(k[6], (B, 2, w_dim), jnp.float32)

    prep = prepare_synthesis_block(params, batch_size=B)     # one-time prep
    apply_fn = jax.jit(lambda w: synthesis_block_apply(prep, w))

    x_out, img_out = apply_fn(ws)
    jax.block_until_ready((x_out, img_out))

    x_ref, img_ref = reference_forward(params, ws)
    assert x_out.shape == (B, C, R, R, R)
    assert img_out.shape == (B, imgC, R, R, R)
    assert bool(jnp.allclose(x_out, x_ref, atol=2e-2, rtol=2e-2)), "conv1 mismatch"
    assert bool(jnp.allclose(img_out, img_ref, atol=2e-2, rtol=2e-2)), "torgb mismatch"

    print("KERNEL_OK")
</pallas_src>

<mosaic_0001>
module attributes {stable_mosaic.version = 11 : i64} {
  func.func @_synthesis_block_kernel(%arg0: i32, %arg1: memref<2x32xf32, #tpu.memory_space<vmem>>, %arg2: memref<2x32xf32, #tpu.memory_space<vmem>>, %arg3: memref<32x16xf32, #tpu.memory_space<vmem>>, %arg4: memref<1x16xf32, #tpu.memory_space<vmem>>, %arg5: memref<32x16xf32, #tpu.memory_space<vmem>>, %arg6: memref<1x16xf32, #tpu.memory_space<vmem>>, %arg7: memref<32x16xf32, #tpu.memory_space<vmem>>, %arg8: memref<32x16xf32, #tpu.memory_space<vmem>>, %arg9: memref<16x512xf32, #tpu.memory_space<vmem>>, %arg10: memref<1x512xf32, #tpu.memory_space<vmem>>, %arg11: memref<32x512xf32, #tpu.memory_space<vmem>>, %arg12: memref<512x512xbf16, #tpu.memory_space<vmem>>, %arg13: memref<6x32xbf16, #tpu.memory_space<vmem>>, %arg14: memref<6x1xf32, #tpu.memory_space<vmem>>, %arg15: memref<32x512xf32, #tpu.memory_space<vmem>>, %arg16: memref<6x512xf32, #tpu.memory_space<vmem>>) attributes {dimension_semantics = [#tpu.dimension_semantics<arbitrary>], iteration_bounds = array<i64: 1>, scalar_prefetch = 0 : i64, scratch_operands = 0 : i64, tpu.core_type = #tpu.core_type<tc>, window_params = [{pipeline_mode = #tpu.pipeline_mode<synchronous>, transform_indices = @transform_0, window_bounds = array<i64: 2, 32>}, {pipeline_mode = #tpu.pipeline_mode<synchronous>, transform_indices = @transform_1, window_bounds = array<i64: 2, 32>}, {pipeline_mode = #tpu.pipeline_mode<synchronous>, transform_indices = @transform_2, window_bounds = array<i64: 32, 16>}, {pipeline_mode = #tpu.pipeline_mode<synchronous>, transform_indices = @transform_3, window_bounds = array<i64: 1, 16>}, {pipeline_mode = #tpu.pipeline_mode<synchronous>, transform_indices = @transform_4, window_bounds = array<i64: 32, 16>}, {pipeline_mode = #tpu.pipeline_mode<synchronous>, transform_indices = @transform_5, window_bounds = array<i64: 1, 16>}, {pipeline_mode = #tpu.pipeline_mode<synchronous>, transform_indices = @transform_6, window_bounds = array<i64: 32, 16>}, {pipeline_mode = #tpu.pipeline_mode<synchronous>, transform_indices = @transform_7, window_bounds = array<i64: 32, 16>}, {pipeline_mode = #tpu.pipeline_mode<synchronous>, transform_indices = @transform_8, window_bounds = array<i64: 16, 512>}, {pipeline_mode = #tpu.pipeline_mode<synchronous>, transform_indices = @transform_9, window_bounds = array<i64: 1, 512>}, {pipeline_mode = #tpu.pipeline_mode<synchronous>, transform_indices = @transform_10, window_bounds = array<i64: 32, 512>}, {pipeline_mode = #tpu.pipeline_mode<synchronous>, transform_indices = @transform_11, window_bounds = array<i64: 512, 512>}, {pipeline_mode = #tpu.pipeline_mode<synchronous>, transform_indices = @transform_12, window_bounds = array<i64: 6, 32>}, {pipeline_mode = #tpu.pipeline_mode<synchronous>, transform_indices = @transform_13, window_bounds = array<i64: 6, 1>}, {pipeline_mode = #tpu.pipeline_mode<synchronous>, transform_indices = @transform_14, window_bounds = array<i64: 32, 512>}, {pipeline_mode = #tpu.pipeline_mode<synchronous>, transform_indices = @transform_15, window_bounds = array<i64: 6, 512>}]} {
    %c0 = arith.constant 0 : index
    %c0_0 = arith.constant 0 : index
    %0 = vector.load %arg1[%c0, %c0_0] : memref<2x32xf32, #tpu.memory_space<vmem>>, vector<2x32xf32>
    %c0_1 = arith.constant 0 : index
    %c0_2 = arith.constant 0 : index
    %1 = vector.load %arg3[%c0_1, %c0_2] : memref<32x16xf32, #tpu.memory_space<vmem>>, vector<32x16xf32>
    %cst = arith.constant dense<0.000000e+00> : vector<2x16xf32>
    %2 = tpu.matmul %0, %1, %cst {dimension_numbers = #tpu.dot_dimension_numbers<[1], [0], [0], [1], [0, 0, 1, 1], [], []>} : vector<2x32xf32>, vector<32x16xf32>, vector<2x16xf32> -> vector<2x16xf32>
    %c0_3 = arith.constant 0 : index
    %c0_4 = arith.constant 0 : index
    %3 = vector.load %arg4[%c0_3, %c0_4] : memref<1x16xf32, #tpu.memory_space<vmem>>, vector<1x16xf32>
    %4 = vector.broadcast %3 : vector<1x16xf32> to vector<2x16xf32>
    %5 = arith.addf %2, %4 : vector<2x16xf32>
    %c0_5 = arith.constant 0 : index
    %c0_6 = arith.constant 0 : index
    %6 = vector.load %arg2[%c0_5, %c0_6] : memref<2x32xf32, #tpu.memory_space<vmem>>, vector<2x32xf32>
    %c0_7 = arith.constant 0 : index
    %c0_8 = arith.constant 0 : index
    %7 = vector.load %arg5[%c0_7, %c0_8] : memref<32x16xf32, #tpu.memory_space<vmem>>, vector<32x16xf32>
    %cst_9 = arith.constant dense<0.000000e+00> : vector<2x16xf32>
    %8 = tpu.matmul %6, %7, %cst_9 {dimension_numbers = #tpu.dot_dimension_numbers<[1], [0], [0], [1], [0, 0, 1, 1], [], []>} : vector<2x32xf32>, vector<32x16xf32>, vector<2x16xf32> -> vector<2x16xf32>
    %c0_10 = arith.constant 0 : index
    %c0_11 = arith.constant 0 : index
    %9 = vector.load %arg6[%c0_10, %c0_11] : memref<1x16xf32, #tpu.memory_space<vmem>>, vector<1x16xf32>
    %10 = vector.broadcast %9 : vector<1x16xf32> to vector<2x16xf32>
    %11 = arith.addf %8, %10 : vector<2x16xf32>
    %12 = vector.extract_strided_slice %5 {offsets = [0, 0], sizes = [1, 16], strides = [1, 1]} : vector<2x16xf32> to vector<1x16xf32>
    %13 = vector.shape_cast %12 : vector<1x16xf32> to vector<1x16xf32>
    %14 = vector.broadcast %13 : vector<1x16xf32> to vector<16x16xf32>
    %15 = vector.extract_strided_slice %5 {offsets = [1, 0], sizes = [1, 16], strides = [1, 1]} : vector<2x16xf32> to vector<1x16xf32>
    %16 = vector.shape_cast %15 : vector<1x16xf32> to vector<1x16xf32>
    %17 = vector.broadcast %16 : vector<1x16xf32> to vector<16x16xf32>
    %18 = tpu.concatenate %14, %17 in 0 : vector<16x16xf32>, vector<16x16xf32> -> vector<32x16xf32>
    %19 = vector.extract_strided_slice %11 {offsets = [0, 0], sizes = [1, 16], strides = [1, 1]} : vector<2x16xf32> to vector<1x16xf32>
    %20 = vector.shape_cast %19 : vector<1x16xf32> to vector<1x16xf32>
    %21 = vector.broadcast %20 : vector<1x16xf32> to vector<16x16xf32>
    %22 = vector.extract_strided_slice %11 {offsets = [1, 0], sizes = [1, 16], strides = [1, 1]} : vector<2x16xf32> to vector<1x16xf32>
    %23 = vector.shape_cast %22 : vector<1x16xf32> to vector<1x16xf32>
    %24 = vector.broadcast %23 : vector<1x16xf32> to vector<16x16xf32>
    %25 = tpu.concatenate %21, %24 in 0 : vector<16x16xf32>, vector<16x16xf32> -> vector<32x16xf32>
    %26 = arith.mulf %18, %18 : vector<32x16xf32>
    %c0_12 = arith.constant 0 : index
    %c0_13 = arith.constant 0 : index
    %27 = vector.load %arg7[%c0_12, %c0_13] : memref<32x16xf32, #tpu.memory_space<vmem>>, vector<32x16xf32>
    %28 = arith.mulf %26, %27 : vector<32x16xf32>
    %cst_14 = arith.constant dense<0.000000e+00> : vector<32xf32>
    %29 = vector.multi_reduction <add>, %28, %cst_14 [1] : vector<32x16xf32> to vector<32xf32>
    %30 = vector.shape_cast %29 : vector<32xf32> to vector<32x1xf32>
    %cst_15 = arith.constant 9.99999993E-9 : f32
    %31 = vector.broadcast %cst_15 : f32 to vector<32x1xf32>
    %32 = arith.addf %30, %31 : vector<32x1xf32>
    %33 = math.rsqrt %32 : vector<32x1xf32>
    %c0_16 = arith.constant 0 : index
    %c0_17 = arith.constant 0 : index
    %34 = vector.load %arg8[%c0_16, %c0_17] : memref<32x16xf32, #tpu.memory_space<vmem>>, vector<32x16xf32>
    %35 = arith.mulf %25, %34 : vector<32x16xf32>
    %cst_18 = arith.constant dense<0.000000e+00> : vector<32xf32>
    %36 = vector.multi_reduction <add>, %35, %cst_18 [1] : vector<32x16xf32> to vector<32xf32>
    %37 = vector.shape_cast %36 : vector<32xf32> to vector<32x1xf32>
    %c0_19 = arith.constant 0 : index
    %c0_20 = arith.constant 0 : index
    %38 = vector.load %arg9[%c0_19, %c0_20] : memref<16x512xf32, #tpu.memory_space<vmem>>, vector<16x512xf32>
    %cst_21 = arith.constant dense<0.000000e+00> : vector<32x512xf32>
    %39 = tpu.matmul %18, %38, %cst_21 {dimension_numbers = #tpu.dot_dimension_numbers<[1], [0], [0], [1], [0, 0, 1, 1], [], []>} : vector<32x16xf32>, vector<16x512xf32>, vector<32x512xf32> -> vector<32x512xf32>
    %40 = vector.broadcast %33 : vector<32x1xf32> to vector<32x512xf32>
    %41 = arith.mulf %39, %40 : vector<32x512xf32>
    %c0_22 = arith.constant 0 : index
    %c0_23 = arith.constant 0 : index
    %42 = vector.load %arg10[%c0_22, %c0_23] : memref<1x512xf32, #tpu.memory_space<vmem>>, vector<1x512xf32>
    %43 = vector.broadcast %42 : vector<1x512xf32> to vector<32x512xf32>
    %44 = arith.addf %41, %43 : vector<32x512xf32>
    %c0_24 = arith.constant 0 : index
    %c0_25 = arith.constant 0 : index
    %45 = vector.load %arg11[%c0_24, %c0_25] : memref<32x512xf32, #tpu.memory_space<vmem>>, vector<32x512xf32>
    %46 = arith.mulf %45, %44 : vector<32x512xf32>
    %47 = arith.truncf %46 : vector<32x512xf32> to vector<32x512xbf16>
    %c0_26 = arith.constant 0 : index
    %c0_27 = arith.constant 0 : index
    %48 = vector.load %arg12[%c0_26, %c0_27] : memref<512x512xbf16, #tpu.memory_space<vmem>>, vector<512x512xbf16>
    %cst_28 = arith.constant dense<0.000000e+00> : vector<32x512xf32>
    %49 = tpu.matmul %47, %48, %cst_28 {dimension_numbers = #tpu.dot_dimension_numbers<[1], [0], [0], [1], [0, 0, 1, 1], [], []>} : vector<32x512xbf16>, vector<512x512xbf16>, vector<32x512xf32> -> vector<32x512xf32>
    %cst_29 = arith.constant 0.000000e+00 : f32
    %50 = vector.broadcast %cst_29 : f32 to vector<32x512xf32>
    %51 = arith.cmpf oge, %49, %50 : vector<32x512xf32>
    %cst_30 = arith.constant 2.000000e-01 : f32
    %52 = vector.broadcast %cst_30 : f32 to vector<32x512xf32>
    %53 = arith.mulf %52, %49 : vector<32x512xf32>
    %54 = arith.select %51, %49, %53 : vector<32x512xi1>, vector<32x512xf32>
    %c0_31 = arith.constant 0 : index
    %c0_32 = arith.constant 0 : index
    %55 = vector.load %arg15[%c0_31, %c0_32] : memref<32x512xf32, #tpu.memory_space<vmem>>, vector<32x512xf32>
    tpu.vector_store %arg15[%c0_31, %c0_32], %54 {strides = array<i32>} : memref<32x512xf32, #tpu.memory_space<vmem>>, vector<32x512xf32>,
    %56 = vector.broadcast %37 : vector<32x1xf32> to vector<32x512xf32>
    %57 = arith.mulf %54, %56 : vector<32x512xf32>
    %58 = arith.truncf %57 : vector<32x512xf32> to vector<32x512xbf16>
    %c0_33 = arith.constant 0 : index
    %c0_34 = arith.constant 0 : index
    %59 = vector.load %arg13[%c0_33, %c0_34] : memref<6x32xbf16, #tpu.memory_space<vmem>>, vector<6x32xbf16>
    %cst_35 = arith.constant dense<0.000000e+00> : vector<6x512xf32>
    %60 = tpu.matmul %59, %58, %cst_35 {dimension_numbers = #tpu.dot_dimension_numbers<[1], [0], [0], [1], [0, 0, 1, 1], [], []>} : vector<6x32xbf16>, vector<32x512xbf16>, vector<6x512xf32> -> vector<6x512xf32>
    %c0_36 = arith.constant 0 : index
    %c0_37 = arith.constant 0 : index
    %61 = vector.load %arg14[%c0_36, %c0_37] : memref<6x1xf32, #tpu.memory_space<vmem>>, vector<6x1xf32>
    %62 = vector.broadcast %61 : vector<6x1xf32> to vector<6x512xf32>
    %63 = arith.addf %60, %62 : vector<6x512xf32>
    %c0_38 = arith.constant 0 : index
    %c0_39 = arith.constant 0 : index
    %64 = vector.load %arg16[%c0_38, %c0_39] : memref<6x512xf32, #tpu.memory_space<vmem>>, vector<6x512xf32>
    tpu.vector_store %arg16[%c0_38, %c0_39], %63 {strides = array<i32>} : memref<6x512xf32, #tpu.memory_space<vmem>>, vector<6x512xf32>,
    return
  }
  func.func @transform_0(%arg0: i32) -> (i32, i32) {
    %c0_i32 = arith.constant 0 : i32
    %c0_i32_0 = arith.constant 0 : i32
    %c0_i32_1 = arith.constant 0 : i32
    return %c0_i32, %c0_i32_0 : i32, i32
  }
  func.func @transform_1(%arg0: i32) -> (i32, i32) {
    %c0_i32 = arith.constant 0 : i32
    %c0_i32_0 = arith.constant 0 : i32
    %c0_i32_1 = arith.constant 0 : i32
    return %c0_i32, %c0_i32_0 : i32, i32
  }
  func.func @transform_2(%arg0: i32) -> (i32, i32) {
    %c0_i32 = arith.constant 0 : i32
    %c0_i32_0 = arith.constant 0 : i32
    %c0_i32_1 = arith.constant 0 : i32
    return %c0_i32, %c0_i32_0 : i32, i32
  }
  func.func @transform_3(%arg0: i32) -> (i32, i32) {
    %c0_i32 = arith.constant 0 : i32
    %c0_i32_0 = arith.constant 0 : i32
    %c0_i32_1 = arith.constant 0 : i32
    return %c0_i32, %c0_i32_0 : i32, i32
  }
  func.func @transform_4(%arg0: i32) -> (i32, i32) {
    %c0_i32 = arith.constant 0 : i32
    %c0_i32_0 = arith.constant 0 : i32
    %c0_i32_1 = arith.constant 0 : i32
    return %c0_i32, %c0_i32_0 : i32, i32
  }
  func.func @transform_5(%arg0: i32) -> (i32, i32) {
    %c0_i32 = arith.constant 0 : i32
    %c0_i32_0 = arith.constant 0 : i32
    %c0_i32_1 = arith.constant 0 : i32
    return %c0_i32, %c0_i32_0 : i32, i32
  }
  func.func @transform_6(%arg0: i32) -> (i32, i32) {
    %c0_i32 = arith.constant 0 : i32
    %c0_i32_0 = arith.constant 0 : i32
    %c0_i32_1 = arith.constant 0 : i32
    return %c0_i32, %c0_i32_0 : i32, i32
  }
  func.func @transform_7(%arg0: i32) -> (i32, i32) {
    %c0_i32 = arith.constant 0 : i32
    %c0_i32_0 = arith.constant 0 : i32
    %c0_i32_1 = arith.constant 0 : i32
    return %c0_i32, %c0_i32_0 : i32, i32
  }
  func.func @transform_8(%arg0: i32) -> (i32, i32) {
    %c0_i32 = arith.constant 0 : i32
    %c0_i32_0 = arith.constant 0 : i32
    %c0_i32_1 = arith.constant 0 : i32
    return %c0_i32, %c0_i32_0 : i32, i32
  }
  func.func @transform_9(%arg0: i32) -> (i32, i32) {
    %c0_i32 = arith.constant 0 : i32
    %c0_i32_0 = arith.constant 0 : i32
    %c0_i32_1 = arith.constant 0 : i32
    return %c0_i32, %c0_i32_0 : i32, i32
  }
  func.func @transform_10(%arg0: i32) -> (i32, i32) {
    %c0_i32 = arith.constant 0 : i32
    %c0_i32_0 = arith.constant 0 : i32
    %c0_i32_1 = arith.constant 0 : i32
    return %c0_i32, %c0_i32_0 : i32, i32
  }
  func.func @transform_11(%arg0: i32) -> (i32, i32) {
    %c0_i32 = arith.constant 0 : i32
    %c0_i32_0 = arith.constant 0 : i32
    %c0_i32_1 = arith.constant 0 : i32
    return %c0_i32, %c0_i32_0 : i32, i32
  }
  func.func @transform_12(%arg0: i32) -> (i32, i32) {
    %c0_i32 = arith.constant 0 : i32
    %c0_i32_0 = arith.constant 0 : i32
    %c0_i32_1 = arith.constant 0 : i32
    return %c0_i32, %c0_i32_0 : i32, i32
  }
  func.func @transform_13(%arg0: i32) -> (i32, i32) {
    %c0_i32 = arith.constant 0 : i32
    %c0_i32_0 = arith.constant 0 : i32
    %c0_i32_1 = arith.constant 0 : i32
    return %c0_i32, %c0_i32_0 : i32, i32
  }
  func.func @transform_14(%arg0: i32) -> (i32, i32) {
    %c0_i32 = arith.constant 0 : i32
    %c0_i32_0 = arith.constant 0 : i32
    %c0_i32_1 = arith.constant 0 : i32
    return %c0_i32, %c0_i32_0 : i32, i32
  }
  func.func @transform_15(%arg0: i32) -> (i32, i32) {
    %c0_i32 = arith.constant 0 : i32
    %c0_i32_0 = arith.constant 0 : i32
    %c0_i32_1 = arith.constant 0 : i32
    return %c0_i32, %c0_i32_0 : i32, i32
  }
}

</mosaic_0001>

<bundles_post_ra>
// kernel: _lambda_.1
= control target key start
LH: loop header
LB: loop body
LE: loop exit
PB: predicated region body
PF: predicated region fallthrough
CT: control target
= control target key end

     0   :  { %21 = vsyncpa [#allocation3], 0  ;;  %s2771_s0 = inlined_call_operand.vmem [shape: f32[2,32], index: 0, kind: input, shape index: {}]   ;;  %s2772_s1 = inlined_call_operand.vmem [shape: f32[2,32], index: 1, kind: input, shape index: {}]   ;;  %s2773_s2 = inlined_call_operand.vmem [shape: f32[32,16], index: 2, kind: input, shape index: {}]   ;;  %s2774_s3 = inlined_call_operand.vmem [shape: f32[1,16], index: 3, kind: input, shape index: {}]   ;;  %s2775_s4 = inlined_call_operand.hbm [shape: f32[32,16], index: 4, kind: input, shape index: {}]   ;;  %s2776_s5 = inlined_call_operand.vmem [shape: f32[1,16], index: 5, kind: input, shape index: {}]   ;;  %s2777_s6 = inlined_call_operand.hbm [shape: f32[32,16], index: 6, kind: input, shape index: {}]   ;;  %s2778_s7 = inlined_call_operand.hbm [shape: f32[32,16], index: 7, kind: input, shape index: {}]   ;;  %s2779_s8 = inlined_call_operand.hbm [shape: f32[16,512], index: 8, kind: input, shape index: {}]   ;;  %s2780_s9 = inlined_call_operand.vmem [shape: f32[1,512], index: 9, kind: input, shape index: {}]   ;;  %s2781_s10 = inlined_call_operand.hbm [shape: f32[32,512], index: 10, kind: input, shape index: {}]   ;;  %s2782_s11 = inlined_call_operand.hbm [shape: bf16[512,512], index: 11, kind: input, shape index: {}]   ;;  %s2783_s12 = inlined_call_operand.hbm [shape: bf16[6,32], index: 12, kind: input, shape index: {}]   ;;  %s2784_s13 = inlined_call_operand.hbm [shape: f32[6,1], index: 13, kind: input, shape index: {}]   ;;  %s2785_s14 = inlined_call_operand.vmem [shape: f32[32,512], index: 14, kind: output, shape index: {0}]   ;;  %s2786_s15 = inlined_call_operand.vmem [shape: f32[6,512], index: 15, kind: output, shape index: {1}]  }
   0x1   :  { %22 = vsyncpa [#allocation5], 0 }
   0x2   :  { %23 = vsyncpa [#allocation8], 0 }
   0x3   :  { %24 = vsyncpa [#allocation11], 0 }
   0x4   :  { %25 = vsyncpa [#allocation14], 0  ;;  %s2418_s18 = smov [#allocation4]   ;;  %s2419_s20 = smov [#allocation7]  }
   0x5   :  { %s53_s19 = sshll.u32 %s2418_s18, 4  ;;  %s77_s21 = sshll.u32 %s2419_s20, 4  ;;  %s54_s19 = int_to_ptr.vmem [resolvable:$true] %s53_s19  ;;  %s78_s21 = int_to_ptr.vmem [resolvable:$true] %s77_s21 }
   0x6   :  { %s2256_s22 = scalar_lea.vmem %s54_s19, 512  ;;  %p2261_p1 = scmp.lt.s32.totalorder %s54_s19, %s54_s19 }
   0x7   :  { %p2257_p0 = scmp.ne.s32.totalorder %s54_s19, %s2256_s22  ;;  %p2262_p2 = scmp.lt.s32.totalorder %s2256_s22, %s2256_s22 }
   0x9   :  { %p2263_p3 = por %p2262_p2, %p2261_p1 }
   0xb   :  { %p2264_p4 = pnand %p2263_p3, %p2257_p0 }
   0xd   :  { %2267 = shalt.err (!%p2264_p4)
}
   0xe   :  { %s2420_s23 = smov 128   ;;  %s2421_s24 = smov 8  }
   0xf   :  { %59 = dma.hbm_to_vmem [thread:$0]  %s2777_s6, 512, %s54_s19, [#allocation5], %s2420_s23, %s2420_s23, %s2421_s24  }
  0x10   :  { %s2276_s27 = scalar_lea.vmem %s78_s21, 1024  ;;  %p2281_p6 = scmp.lt.s32.totalorder %s78_s21, %s78_s21 }
  0x11   :  { %p2277_p5 = scmp.ne.s32.totalorder %s78_s21, %s2276_s27  ;;  %p2282_p7 = scmp.lt.s32.totalorder %s2276_s27, %s2276_s27 }
  0x13   :  { %p2283_p8 = por %p2282_p7, %p2281_p6 }
  0x15   :  { %p2284_p9 = pnand %p2283_p8, %p2277_p5 }
  0x17   :  { %2287 = shalt.err (!%p2284_p9)
}
  0x18   :  { %s2422_s28 = smov 512   ;;  %s2423_s29 = smov 32  }
  0x19   :  { %83 = dma.hbm_to_vmem [thread:$0]  %s2779_s8, 1024, %s78_s21, [#allocation8], %s2422_s28, %s2422_s28, %s2423_s29  }
  0x1a   :  { %s2424_s17 = smov [#allocation10]  }
  0x1b   :  { %s103_s18 = sshll.u32 %s2424_s17, 4  ;;  %s104_s18 = int_to_ptr.vmem [resolvable:$true] %s103_s18 }
  0x1c   :  { %s2296_s6 = scalar_lea.vmem %s104_s18, 16384  ;;  %p2301_p11 = scmp.lt.s32.totalorder %s104_s18, %s104_s18 }
  0x1d   :  { %p2297_p10 = scmp.ne.s32.totalorder %s104_s18, %s2296_s6  ;;  %p2302_p12 = scmp.lt.s32.totalorder %s2296_s6, %s2296_s6 }
  0x1f   :  { %p2303_p13 = por %p2302_p12, %p2301_p11 }
  0x21   :  { %p2304_p0 = pnand %p2303_p13, %p2297_p10 }
  0x23   :  { %2307 = shalt.err (!%p2304_p0)
}
  0x24   :  { %s2425_s19 = smov 256   ;;  %s2426_s20 = smov 16  }
  0x25   :  { %109 = dma.hbm_to_vmem [thread:$0]  %s2782_s11, 16384, %s104_s18, [#allocation11], %s2425_s19, %s2425_s19, %s2426_s20  }
  0x26   :  { %s2427_s26 = smov [#allocation2]   ;;  %s2428_s8 = smov [#allocation6]  }
  0x27   :  { %s39_s27 = sshll.u32 %s2427_s26, 4  ;;  %s65_s21 = sshll.u32 %s2428_s8, 4  ;;  %s40_s27 = int_to_ptr.vmem [resolvable:$true] %s39_s27  ;;  %s66_s21 = int_to_ptr.vmem [resolvable:$true] %s65_s21 }
  0x28   :  { %s2316_s30 = scalar_lea.vmem %s40_s27, 512  ;;  %p2321_p2 = scmp.lt.s32.totalorder %s40_s27, %s40_s27 }
  0x29   :  { %p2317_p1 = scmp.ne.s32.totalorder %s40_s27, %s2316_s30  ;;  %p2322_p3 = scmp.lt.s32.totalorder %s2316_s30, %s2316_s30 }
  0x2b   :  { %p2323_p4 = por %p2322_p3, %p2321_p2 }
  0x2d   :  { %p2324_p5 = pnand %p2323_p4, %p2317_p1 }
  0x2f   :  { %2327 = shalt.err (!%p2324_p5)
}
  0x30   :  { %45 = dma.hbm_to_vmem [thread:$0]  %s2775_s4, 512, %s40_s27, [#allocation3], %s2420_s23, %s2420_s23, %s2421_s24  }
  0x31   :  { %s2336_s11 = scalar_lea.vmem %s66_s21, 512  ;;  %p2341_p7 = scmp.lt.s32.totalorder %s66_s21, %s66_s21 }
  0x32   :  { %p2337_p6 = scmp.ne.s32.totalorder %s66_s21, %s2336_s11  ;;  %p2342_p8 = scmp.lt.s32.totalorder %s2336_s11, %s2336_s11 }
  0x34   :  { %p2343_p9 = por %p2342_p8, %p2341_p7 }
  0x36   :  { %p2344_p10 = pnand %p2343_p9, %p2337_p6 }
  0x38   :  { %2347 = shalt.err (!%p2344_p10)
}
  0x39   :  { %71 = dma.hbm_to_vmem [thread:$0]  %s2778_s7, 512, %s66_s21, [#allocation5], %s2420_s23, %s2420_s23, %s2421_s24  }
  0x3a   :  { %s2429_s19 = smov [#allocation9]   ;;  %s2430_s22 = smov [#allocation12]  }
  0x3b   :  { %s91_s20 = sshll.u32 %s2429_s19, 4  ;;  %s116_s4 = sshll.u32 %s2430_s22, 4  ;;  %s92_s20 = int_to_ptr.vmem [resolvable:$true] %s91_s20  ;;  %s117_s4 = int_to_ptr.vmem [resolvable:$true] %s116_s4 }
  0x3c   :  { %s2356_s25 = scalar_lea.vmem %s92_s20, 2048  ;;  %p2361_p12 = scmp.lt.s32.totalorder %s92_s20, %s92_s20 }
  0x3d   :  { %p2357_p11 = scmp.ne.s32.totalorder %s92_s20, %s2356_s25  ;;  %p2362_p13 = scmp.lt.s32.totalorder %s2356_s25, %s2356_s25 }
  0x3f   :  { %p2363_p0 = por %p2362_p13, %p2361_p12 }
  0x41   :  { %p2364_p1 = pnand %p2363_p0, %p2357_p11 }
  0x43   :  { %2367 = shalt.err (!%p2364_p1)
}
  0x44   :  { %97 = dma.hbm_to_vmem [thread:$0]  %s2781_s10, 2048, %s92_s20, [#allocation8], %s2422_s28, %s2422_s28, %s2423_s29  }
  0x45   :  { %s2376_s7 = scalar_lea.vmem %s117_s4, 64  ;;  %p2381_p3 = scmp.lt.s32.totalorder %s117_s4, %s117_s4 }
  0x46   :  { %p2377_p2 = scmp.ne.s32.totalorder %s117_s4, %s2376_s7  ;;  %p2382_p4 = scmp.lt.s32.totalorder %s2376_s7, %s2376_s7 }
  0x48   :  { %p2383_p5 = por %p2382_p4, %p2381_p3 }
  0x4a   :  { %p2384_p6 = pnand %p2383_p5, %p2377_p2 }
  0x4c   :  { %2387 = shalt.err (!%p2384_p6)
}
  0x4d   :  { %119 = dma.hbm_to_vmem [thread:$0]  %s2783_s12, 64, %s117_s4, [#allocation11]  }
  0x4e   :  { %s2431_s8 = smov [#allocation13]  }
  0x4f   :  { %s126_s21 = sshll.u32 %s2431_s8, 4  ;;  %s127_s21 = int_to_ptr.vmem [resolvable:$true] %s126_s21 }
  0x50   :  { %s2396_s30 = scalar_lea.vmem %s127_s21, 128  ;;  %p2401_p8 = scmp.lt.s32.totalorder %s127_s21, %s127_s21 }
  0x51   :  { %p2397_p7 = scmp.ne.s32.totalorder %s127_s21, %s2396_s30  ;;  %p2402_p9 = scmp.lt.s32.totalorder %s2396_s30, %s2396_s30 }
  0x53   :  { %p2403_p10 = por %p2402_p9, %p2401_p8 }
  0x55   :  { %p2404_p11 = pnand %p2403_p10, %p2397_p7 }
  0x57   :  { %2407 = shalt.err (!%p2404_p11)
}
  0x58   :  { %129 = dma.hbm_to_vmem [thread:$0]  %s2784_s13, 128, %s127_s21, [#allocation14]  }
  0x59   :  { %2408 = dma.done.wait [#allocation3], 512  }
  0x5a   :  { %2409 = vsyncadd [#allocation3], 4294966784 }
  0x5b   :  { %2410 = dma.done.wait [#allocation5], 1024  }
  0x5c   :  { %2411 = vsyncadd [#allocation5], 4294966272 }
  0x5d   :  { %2412 = dma.done.wait [#allocation8], 3072  }
  0x5e   :  { %2413 = vsyncadd [#allocation8], 4294964224 }
  0x5f   :  { %2414 = dma.done.wait [#allocation11], 16448  }
  0x60   :  { %2415 = vsyncadd [#allocation11], 4294950848 }
  0x61   :  { %2416 = dma.done.wait [#allocation14], 128  }
  0x62   :  { %2417 = vsyncadd [#allocation14], 4294967168  ;;  %v2432_v0 = vmov 0.0   ;;  %vm2433_vm0 = vmmov 0   ;;  %v159_v1 = vld [vmem:[%s2773_s2 + $0x18] sm:$0xff]  ;;  %v158_v2 = vld [vmem:[%s2773_s2 + $0x10] sm:$0xff]  ;;  %v326_v19 = vlaneseq }
  0x63   :  { %2008 = vmatprep.subr.mxu0 %v2432_v0  ;;  %2016 = vmatprep.mubr.msk.f32.mxu0 %vm2433_vm0, %v2432_v0  ;;  %v245_v3 = vld [vmem:[#allocation2 + $0x18] sm:$0xff]  ;;  %v157_v4 = vld [vmem:[%s2773_s2 + $0x8] sm:$0xff]  ;;  %v156_v5 = vld [vmem:[%s2773_s2] sm:$0xff]  ;;  %vm167_vm1 = vcmask 261120   ;;  %vm354_vm2 = vcmask 130048  }
  0x64   :  { %2019 = vmatprep.subr.mxu1 %v2432_v0  ;;  %2027 = vmatprep.mubr.msk.f32.mxu1 %vm2433_vm0, %v2432_v0  ;;  %v244_v6 = vld [vmem:[#allocation2 + $0x10] sm:$0xff]  ;;  %v155_v7 = vld [vmem:[%s2771_s0] sm:$0x3]  ;;  %v243_v8 = vld [vmem:[#allocation2 + $0x8] sm:$0xff]  ;;  %v2586_v20 = vshrl.u32 %v326_v19, 7 }
  0x65   :  { %2009 = vmatpush3.msra.mxu0 %v159_v1  ;;  %2020 = vmatpush3.msra.mxu1 %v245_v3  ;;  %v242_v9 = vld [vmem:[#allocation2] sm:$0xff]  ;;  %v400_v11 = vld [vmem:[#allocation7 + $0x28] sm:$0xff]  ;;  %v402_v12 = vld [vmem:[#allocation7 + $0x38] sm:$0xff] }
  0x66   :  { %2010 = vmatprep.subr.mxu0 %v2432_v0  ;;  %2021 = vmatprep.subr.mxu1 %v2432_v0  ;;  %v241_v10 = vld [vmem:[%s2772_s1] sm:$0x3]  ;;  %v401_v14 = vld [vmem:[#allocation7 + $0x30] sm:$0xff]  ;;  %v396_v15 = vld [vmem:[#allocation7 + $0x8] sm:$0xff]  ;;  %v2592_v22 = vsub.s32 0, %v2586_v20  ;;  %v2595_v23 = vsub.s32 1, %v2586_v20 }
  0x67   :  { %2011 = vmatpush3.msra.mxu0 %v158_v2  ;;  %2022 = vmatpush3.msra.mxu1 %v244_v6  ;;  %v399_v13 = vld [vmem:[#allocation7 + $0x20] sm:$0xff]  ;;  %v398_v16 = vld [vmem:[#allocation7 + $0x18] sm:$0xff]  ;;  %v397_v18 = vld [vmem:[#allocation7 + $0x10] sm:$0xff] }
  0x68   :  { %2012 = vmatprep.subr.mxu0 %v2432_v0  ;;  %2023 = vmatprep.subr.mxu1 %v2432_v0  ;;  %v395_v17 = vld [vmem:[#allocation7] sm:$0xff]  ;;  %v348_v29 = vld [vmem:[#allocation4 + $0x10] sm:$0xff]  ;;  %v349_v33 = vld [vmem:[#allocation4 + $0x18] sm:$0xff] }
  0x69   :  { %2013 = vmatpush3.msra.mxu0 %v157_v4  ;;  %2024 = vmatpush3.msra.mxu1 %v243_v8  ;;  %v1856_v21 = vld [vmem:[%s2774_s3] ss:$0 sm:$0xff]  ;;  %v347_v34 = vld [vmem:[#allocation4 + $0x8] sm:$0xff]  ;;  %v2050_v43 = vld [vmem:[#allocation10 + $0xe4] ss:$16 sps:$4 sm:$0xff]  }
  0x6a   :  { %2014 = vmatprep.subr.mxu0 %v2432_v0  ;;  %2025 = vmatprep.subr.mxu1 %v2432_v0  ;;  %v346_v30 = vld [vmem:[#allocation4] sm:$0xff] }
  0x6b   :  { %2015 = vmatpush3.msra.mxu0 %v156_v5  ;;  %2026 = vmatpush3.msra.mxu1 %v242_v9  ;;  %v2053_v44 = vld [vmem:[#allocation10 + $0x2e4] ss:$16 sps:$4 sm:$0xff]   ;;  %v2048_v45 = vld [vmem:[#allocation10 + $0xe0] ss:$16 sps:$4 sm:$0xff]  }
  0x6c   :  { %2017 = vmatmul.mubr.msk.f32.vlgmr.msra.gmra.mxu0 %vm167_vm1, %v155_v7  ;;  %2028 = vmatmul.mubr.msk.f32.vlgmr.msra.gmra.mxu1 %vm167_vm1, %v241_v10  ;;  %v2051_v46 = vld [vmem:[#allocation10 + $0x2e0] ss:$16 sps:$4 sm:$0xff]   ;;  %v2056_v47 = vld [vmem:[#allocation10 + $0xc4] ss:$16 sps:$4 sm:$0xff]  }
  0x6d   :  { %471 = vmatprep.mubr.f32.mxu0 %v2432_v0  ;;  %560 = vmatprep.mubr.f32.mxu1 %v2432_v0  ;;  %v2059_v48 = vld [vmem:[#allocation10 + $0x2c4] ss:$16 sps:$4 sm:$0xff]   ;;  %v2054_v49 = vld [vmem:[#allocation10 + $0xc0] ss:$16 sps:$4 sm:$0xff]  }
  0x6e   :  { %435 = vmatprep.subr.mxu0 %v400_v11  ;;  %524 = vmatprep.subr.mxu1 %v402_v12  ;;  %v2057_v50 = vld [vmem:[#allocation10 + $0x2c0] ss:$16 sps:$4 sm:$0xff]   ;;  %v2062_v52 = vld [vmem:[#allocation10 + $0xa4] ss:$16 sps:$4 sm:$0xff]   ;;  %v378_v11 = vld [vmem:[#allocation6 + $0x18] sm:$0xff] }
  0x6f   :  { %436 = vmatpush1.msra.mxu0 %v399_v13  ;;  %525 = vmatpush1.msra.mxu1 %v401_v14  ;;  %v2060_v51 = vld [vmem:[#allocation10 + $0xa0] ss:$16 sps:$4 sm:$0xff]   ;;  %v2065_v55 = vld [vmem:[#allocation10 + $0x2a4] ss:$16 sps:$4 sm:$0xff]  }
  0x70   :  { %437 = vmatprep.subr.mxu0 %v396_v15  ;;  %526 = vmatprep.subr.mxu1 %v398_v16  ;;  %v2063_v53 = vld [vmem:[#allocation10 + $0x2a0] ss:$16 sps:$4 sm:$0xff]   ;;  %v2068_v56 = vld [vmem:[#allocation10 + $0x84] ss:$16 sps:$4 sm:$0xff]  }
  0x71   :  { %438 = vmatpush1.msra.mxu0 %v395_v17  ;;  %527 = vmatpush1.msra.mxu1 %v397_v18  ;;  %v2071_v57 = vld [vmem:[#allocation10 + $0x284] ss:$16 sps:$4 sm:$0xff]   ;;  %v2066_v59 = vld [vmem:[#allocation10 + $0x80] ss:$16 sps:$4 sm:$0xff]  }
  0x72   :  { %1447 = vmatprep.subr.bf16.mxu0 %v2050_v43  ;;  %1500 = vmatprep.subr.bf16.mxu1 %v2053_v44  ;;  %v2069_v60 = vld [vmem:[#allocation10 + $0x280] ss:$16 sps:$4 sm:$0xff]   ;;  %v2074_v61 = vld [vmem:[#allocation10 + $0x64] ss:$16 sps:$4 sm:$0xff]  }
  0x73   :  { %v2077_v62 = vld [vmem:[#allocation10 + $0x264] ss:$16 sps:$4 sm:$0xff]   ;;  %v2072_v63 = vld [vmem:[#allocation10 + $0x60] ss:$16 sps:$4 sm:$0xff]  }
  0x74   :  { %v2080_v1 = vld [vmem:[#allocation10 + $0x44] ss:$16 sps:$4 sm:$0xff]   ;;  %v2078_v3 = vld [vmem:[#allocation10 + $0x40] ss:$16 sps:$4 sm:$0xff]  }
  0x75   :  { %v2083_v2 = vld [vmem:[#allocation10 + $0x244] ss:$16 sps:$4 sm:$0xff]   ;;  %v2081_v4 = vld [vmem:[#allocation10 + $0x240] ss:$16 sps:$4 sm:$0xff]  }
  0x76   :  { %v2086_v5 = vld [vmem:[#allocation10 + $0x24] ss:$16 sps:$4 sm:$0xff]   ;;  %v1858_v6 = vld [vmem:[%s2776_s5] ss:$0 sm:$0xff] }
  0x77   :  { %v2089_v7 = vld [vmem:[#allocation10 + $0x224] ss:$16 sps:$4 sm:$0xff]   ;;  %v2084_v9 = vld [vmem:[#allocation10 + $0x20] ss:$16 sps:$4 sm:$0xff]  }
  0x78   :  { %v2087_v12 = vld [vmem:[#allocation10 + $0x220] ss:$16 sps:$4 sm:$0xff]   ;;  %v2092_v13 = vld [vmem:[#allocation10 + $0x4] ss:$16 sps:$4 sm:$0xff]  }
  0x79   :  { %v2095_v14 = vld [vmem:[#allocation10 + $0x204] ss:$16 sps:$4 sm:$0xff]   ;;  %v2090_v16 = vld [vmem:[#allocation10] ss:$16 sps:$4 sm:$0xff]  }
  0x7a   :  { %v2093_v18 = vld [vmem:[#allocation10 + $0x200] ss:$16 sps:$4 sm:$0xff]   ;;  %v2098_v19 = vld [vmem:[#allocation10 + $0x1e4] ss:$16 sps:$4 sm:$0xff]  }
  0x7b   :  { %v2123_v43 = vld [vmem:[#allocation10 + $0x360] ss:$16 sps:$4 sm:$0xff]  }
 0x12c   :  { %v237_v24 = vpop.f32.mrf.mxu0  ;;  %v322_v54 = vpop.f32.mrf.mxu1 }
 0x12d   :  { %v238_v25 = vadd.f32 %v1856_v21, %v237_v24  ;;  %v323_v8 = vadd.f32 %v1858_v6, %v322_v54  ;;  %v2101_v21 = vld [vmem:[#allocation10 + $0x3e4] ss:$16 sps:$4 sm:$0xff]   ;;  %v2096_v24 = vld [vmem:[#allocation10 + $0x1e0] ss:$16 sps:$4 sm:$0xff]  }
 0x12e   :  { %v2018_v26 = vpop.f32.mrf.mxu0  ;;  %v2029_v58 = vpop.f32.mrf.mxu1 }
 0x12f   :  { %v329_v27 = vrot.slane %v238_v25, %v2592_v22  ;;  %v333_v28 = vrot.slane %v238_v25, %v2595_v23  ;;  %v343_v10 = vrot.slane %v323_v8, %v2595_v23  ;;  %v2099_v25 = vld [vmem:[#allocation10 + $0x3e0] ss:$16 sps:$4 sm:$0xff]   ;;  %v2104_v26 = vld [vmem:[#allocation10 + $0x1c4] ss:$16 sps:$4 sm:$0xff]  }
 0x130   :  { %v2132_v58 = vld [vmem:[#allocation10 + $0x120] ss:$16 sps:$4 sm:$0xff]  }
 0x131   :  { %1860 = vmatmul.mubr.msk.f32.vlgmr.msra.gmra.mxu0 %vm354_vm2, %v329_v27  ;;  %1864 = vmatmul.mubr.msk.f32.vlgmr.msra.gmra.mxu1 %vm354_vm2, %v329_v27  ;;  %v345_v31 = vmul.f32 %v333_v28, %v333_v28  ;;  %v344_v32 = vmul.f32 %v329_v27, %v329_v27  ;;  %v382_v15 = vmul.f32 %v378_v11, %v343_v10  ;;  %v601_v11 = vld [vmem:[%s2780_s9] sm:$0xf] }
 0x132   :  { %477 = vmatprep.mubr.f32.mxu0 %v2432_v0  ;;  %566 = vmatprep.mubr.f32.mxu1 %v2432_v0 }
 0x133   :  { %v352_v35 = vmul.f32 %v348_v29, %v345_v31  ;;  %v350_v36 = vmul.f32 %v346_v30, %v344_v32  ;;  %v353_v39 = vmul.f32 %v349_v33, %v345_v31  ;;  %v351_v40 = vmul.f32 %v347_v34, %v344_v32  ;;  %1448 = vmatpush1.bf16.msra.mxu0 %v2048_v45  ;;  %v2105_v29 = vld [vmem:[#allocation10 + $0x3c0] ss:$16 sps:$4 sm:$0xff]   ;;  %v2110_v30 = vld [vmem:[#allocation10 + $0x1a4] ss:$16 sps:$4 sm:$0xff]  }
 0x134   :  { %1501 = vmatpush1.bf16.msra.mxu1 %v2051_v46  ;;  %1449 = vmatprep.subr.bf16.mxu0 %v2056_v47  ;;  %v392_v17 = vsel %vm354_vm2, %v382_v15, 0.0  ;;  %v2113_v31 = vld [vmem:[#allocation10 + $0x3a4] ss:$16 sps:$4 sm:$0xff]   ;;  %v2108_v32 = vld [vmem:[#allocation10 + $0x1a0] ss:$16 sps:$4 sm:$0xff]   ;;  %v376_v46 = vld [vmem:[#allocation6 + $0x8] sm:$0xff] }
 0x135   :  { %1861 = vmatmul.mubr.msk.f32.gmra.mxu0 %vm354_vm2, %v329_v27  ;;  %1865 = vmatmul.mubr.msk.f32.gmra.mxu1 %vm354_vm2, %v329_v27  ;;  %v361_v37 = vsel %vm354_vm2, %v352_v35, 0.0  ;;  %v355_v38 = vsel %vm354_vm2, %v350_v36, 0.0  ;;  %v364_v41 = vsel %vm354_vm2, %v353_v39, 0.0  ;;  %v358_v42 = vsel %vm354_vm2, %v351_v40, 0.0  ;;  %v2107_v27 = vld [vmem:[#allocation10 + $0x3c4] ss:$16 sps:$4 sm:$0xff]  }
 0x136   :  { %362 = vadd.xlane.f32.xlu1 %v361_v37  ;;  %356 = vadd.xlane.f32.xlu0 %v355_v38  ;;  %v2111_v33 = vld [vmem:[#allocation10 + $0x3a0] ss:$16 sps:$4 sm:$0xff]   ;;  %v2116_v34 = vld [vmem:[#allocation10 + $0x184] ss:$16 sps:$4 sm:$0xff]  }
 0x137   :  { %483 = vmatprep.mubr.f32.mxu0 %v2432_v0  ;;  %572 = vmatprep.mubr.f32.mxu1 %v2432_v0  ;;  %v2119_v35 = vld [vmem:[#allocation10 + $0x384] ss:$16 sps:$4 sm:$0xff]   ;;  %v2114_v36 = vld [vmem:[#allocation10 + $0x180] ss:$16 sps:$4 sm:$0xff]  }
 0x138   :  { %1502 = vmatprep.subr.bf16.mxu1 %v2059_v48  ;;  %1450 = vmatpush1.bf16.msra.mxu0 %v2054_v49  ;;  %v2117_v37 = vld [vmem:[#allocation10 + $0x380] ss:$16 sps:$4 sm:$0xff]   ;;  %v2122_v38 = vld [vmem:[#allocation10 + $0x164] ss:$16 sps:$4 sm:$0xff]  }
 0x139   :  { %1862 = vmatmul.mubr.msk.f32.gmra.mxu0 %vm354_vm2, %v333_v28  ;;  %1866 = vmatmul.mubr.msk.f32.gmra.mxu1 %vm354_vm2, %v333_v28  ;;  %v2125_v39 = vld [vmem:[#allocation10 + $0x364] ss:$16 sps:$4 sm:$0xff]   ;;  %v2120_v40 = vld [vmem:[#allocation10 + $0x160] ss:$16 sps:$4 sm:$0xff]  }
 0x13a   :  { %365 = vadd.xlane.f32.xlu1 %v364_v41  ;;  %359 = vadd.xlane.f32.xlu0 %v358_v42  ;;  %v377_v41 = vld [vmem:[#allocation6 + $0x10] sm:$0xff]  ;;  %v339_v42 = vrot.slane %v323_v8, %v2592_v22  ;;  %v375_v47 = vld [vmem:[#allocation6] sm:$0xff] }
 0x13b   :  { %489 = vmatprep.mubr.f32.mxu0 %v2432_v0  ;;  %578 = vmatprep.mubr.f32.mxu1 %v2432_v0  ;;  %v2075_v0 = vld [vmem:[#allocation10 + $0x260] ss:$16 sps:$4 sm:$0xff]   ;;  %v381_v44 = vmul.f32 %v377_v41, %v343_v10  ;;  %v2128_v48 = vld [vmem:[#allocation10 + $0x144] ss:$16 sps:$4 sm:$0xff]   ;;  %v613_v10 = vsub.s32 2, %v2586_v20 }
 0x13c   :  { %1503 = vmatpush1.bf16.msra.mxu1 %v2057_v50  ;;  %1451 = vmatprep.subr.bf16.mxu0 %v2062_v52  ;;  %v2131_v49 = vld [vmem:[#allocation10 + $0x344] ss:$16 sps:$4 sm:$0xff]   ;;  %v380_v50 = vmul.f32 %v376_v46, %v339_v42  ;;  %v2129_v52 = vld [vmem:[#allocation10 + $0x340] ss:$16 sps:$4 sm:$0xff]   ;;  %v646_v46 = vld [vmem:[#allocation9 + $0x38] sm:$0xff] }
 0x13d   :  { %1863 = vmatmul.mubr.msk.f32.gmra.mxu0 %vm354_vm2, %v333_v28  ;;  %1867 = vmatmul.mubr.msk.f32.gmra.mxu1 %vm354_vm2, %v333_v28  ;;  %v2102_v28 = vld [vmem:[#allocation10 + $0x1c0] ss:$16 sps:$4 sm:$0xff]   ;;  %v389_v45 = vsel %vm354_vm2, %v381_v44, 0.0 }
 0x13e   :  { %1504 = vmatprep.subr.bf16.mxu1 %v2065_v55  ;;  %1452 = vmatpush1.bf16.msra.mxu0 %v2060_v51  ;;  %v2126_v51 = vld [vmem:[#allocation10 + $0x140] ss:$16 sps:$4 sm:$0xff]   ;;  %v386_v54 = vsel %vm354_vm2, %v380_v50, 0.0 }
 0x13f   :  { %1453 = vmatprep.subr.bf16.mxu0 %v2068_v56  ;;  %393 = vadd.xlane.f32.xlu1 %v392_v17  ;;  %v2134_v56 = vld [vmem:[#allocation10 + $0x124] ss:$16 sps:$4 sm:$0xff]   ;;  %v2631_v17 = vrot.slane %v601_v11, %v613_v10  ;;  %v648_v10 = vld [vmem:[#allocation9 + $0x48] sm:$0xff] }
 0x140   :  { %1505 = vmatpush1.bf16.msra.mxu1 %v2063_v53  ;;  %390 = vadd.xlane.f32.xlu0 %v389_v45  ;;  %v379_v53 = vmul.f32 %v375_v47, %v339_v42  ;;  %v643_v44 = vld [vmem:[#allocation9 + $0x20] sm:$0xff]  ;;  %v644_v45 = vld [vmem:[#allocation9 + $0x28] sm:$0xff]  ;;  %v645_v50 = vld [vmem:[#allocation9 + $0x30] sm:$0xff] }
 0x141   :  { %1506 = vmatprep.subr.bf16.mxu1 %v2071_v57  ;;  %v2137_v57 = vld [vmem:[#allocation10 + $0x324] ss:$16 sps:$4 sm:$0xff]  }
 0x142   :  { %1454 = vmatpush1.bf16.msra.mxu0 %v2066_v59  ;;  %v383_v55 = vsel %vm354_vm2, %v379_v53, 0.0  ;;  %v2135_v59 = vld [vmem:[#allocation10 + $0x320] ss:$16 sps:$4 sm:$0xff]  }
 0x143   :  { %1455 = vmatprep.subr.bf16.mxu0 %v2074_v61  ;;  %387 = vadd.xlane.f32.xlu1 %v386_v54  ;;  %v2143_v61 = vld [vmem:[#allocation10 + $0x304] ss:$16 sps:$4 sm:$0xff]  }
 0x144   :  { %1507 = vmatpush1.bf16.msra.mxu1 %v2069_v60  ;;  %384 = vadd.xlane.f32.xlu0 %v383_v55  ;;  %v2140_v60 = vld [vmem:[#allocation10 + $0x104] ss:$16 sps:$4 sm:$0xff]  }
 0x145   :  { %1508 = vmatprep.subr.bf16.mxu1 %v2077_v62  ;;  %v2138_v62 = vld [vmem:[#allocation10 + $0x100] ss:$16 sps:$4 sm:$0xff]  }
 0x146   :  { %1456 = vmatpush1.bf16.msra.mxu0 %v2072_v63  ;;  %v2141_v63 = vld [vmem:[#allocation10 + $0x300] ss:$16 sps:$4 sm:$0xff]  }
 0x147   :  { %1457 = vmatprep.subr.bf16.mxu0 %v2080_v1  ;;  %v2149_v1 = vld [vmem:[#allocation10 + $0x2ec] ss:$16 sps:$4 sm:$0xff]  }
 0x148   :  { %1509 = vmatpush1.bf16.msra.mxu1 %v2075_v0  ;;  %v2146_v0 = vld [vmem:[#allocation10 + $0xec] ss:$16 sps:$4 sm:$0xff]  }
 0x149   :  { %1510 = vmatprep.subr.bf16.mxu1 %v2083_v2 }
 0x14a   :  { %1458 = vmatpush1.bf16.msra.mxu0 %v2078_v3 }
 0x14b   :  { %1459 = vmatprep.subr.bf16.mxu0 %v2086_v5 }
 0x14c   :  { %1511 = vmatpush1.bf16.msra.mxu1 %v2081_v4 }
 0x14d   :  { %1512 = vmatprep.subr.bf16.mxu1 %v2089_v7 }
 0x14e   :  { %1460 = vmatpush1.bf16.msra.mxu0 %v2084_v9 }
 0x14f   :  { %1461 = vmatprep.subr.bf16.mxu0 %v2092_v13 }
 0x150   :  { %1513 = vmatpush1.bf16.msra.mxu1 %v2087_v12 }
 0x151   :  { %1514 = vmatprep.subr.bf16.mxu1 %v2095_v14  ;;  %v617_v14 = vsub.s32 3, %v2586_v20 }
 0x152   :  { %1462 = vmatpush1.bf16.msra.mxu0 %v2090_v16 }
 0x153   :  { %1463 = vmatprep.subr.bf16.mxu0 %v2098_v19  ;;  %v2634_v19 = vrot.slane %v601_v11, %v2592_v22 }
 0x154   :  { %1515 = vmatpush1.bf16.msra.mxu1 %v2093_v18 }
 0x155   :  { %1516 = vmatprep.subr.bf16.mxu1 %v2101_v21 }
 0x156   :  { %1464 = vmatpush2.bf16.msra.mxu0 %v2096_v24 }
 0x157   :  { %1465 = vmatprep.subr.bf16.mxu0 %v2104_v26  ;;  %v2637_v26 = vrot.slane %v601_v11, %v2595_v23  ;;  %v640_v23 = vld [vmem:[#allocation9 + $0x8] sm:$0xff] }
 0x158   :  { %1517 = vmatpush2.bf16.msra.mxu1 %v2099_v25 }
 0x159   :  { %1518 = vmatprep.subr.bf16.mxu1 %v2107_v27 }
 0x15a   :  { %1466 = vmatpush2.bf16.msra.mxu0 %v2102_v28  ;;  %v2639_v28 = vrot.slane %v601_v11, %v617_v14 }
 0x15b   :  { %1467 = vmatprep.subr.bf16.mxu0 %v2110_v30 }
 0x15c   :  { %1519 = vmatpush2.bf16.msra.mxu1 %v2105_v29 }
 0x15d   :  { %1520 = vmatprep.subr.bf16.mxu1 %v2113_v31 }
 0x15e   :  { %1468 = vmatpush2.bf16.msra.mxu0 %v2108_v32 }
 0x15f   :  { %1469 = vmatprep.subr.bf16.mxu0 %v2116_v34 }
 0x160   :  { %1521 = vmatpush2.bf16.msra.mxu1 %v2111_v33 }
 0x161   :  { %1522 = vmatprep.subr.bf16.mxu1 %v2119_v35 }
 0x162   :  { %1470 = vmatpush2.bf16.msra.mxu0 %v2114_v36  ;;  %v641_v36 = vld [vmem:[#allocation9 + $0x10] sm:$0xff] }
 0x163   :  { %1471 = vmatprep.subr.bf16.mxu0 %v2122_v38 }
 0x164   :  { %1523 = vmatpush2.bf16.msra.mxu1 %v2117_v37  ;;  %v639_v37 = vld [vmem:[#allocation9] sm:$0xff] }
 0x165   :  { %1524 = vmatprep.subr.bf16.mxu1 %v2125_v39 }
 0x166   :  { %1472 = vmatpush2.bf16.msra.mxu0 %v2120_v40 }
 0x167   :  { %1473 = vmatprep.subr.bf16.mxu0 %v2128_v48 }
 0x168   :  { %1525 = vmatpush2.bf16.msra.mxu1 %v2123_v43 }
 0x169   :  { %1526 = vmatprep.subr.bf16.mxu1 %v2131_v49  ;;  %v642_v49 = vld [vmem:[#allocation9 + $0x18] sm:$0xff] }
 0x16a   :  { %1474 = vmatpush2.bf16.msra.mxu0 %v2126_v51 }
 0x16b   :  { %1475 = vmatprep.subr.bf16.mxu0 %v2134_v56 }
 0x16c   :  { %1527 = vmatpush2.bf16.msra.mxu1 %v2129_v52 }
 0x16d   :  { %1528 = vmatprep.subr.bf16.mxu1 %v2137_v57 }
 0x16e   :  { %1476 = vmatpush2.bf16.msra.mxu0 %v2132_v58 }
 0x16f   :  { %1477 = vmatprep.subr.bf16.mxu0 %v2140_v60 }
 0x170   :  { %1529 = vmatpush2.bf16.msra.mxu1 %v2135_v59 }
 0x171   :  { %1530 = vmatprep.subr.bf16.mxu1 %v2143_v61 }
 0x172   :  { %1478 = vmatpush2.bf16.msra.mxu0 %v2138_v62 }
 0x173   :  { %1553 = vmatprep.subr.bf16.mxu0 %v2146_v0 }
 0x174   :  { %1531 = vmatpush2.bf16.msra.mxu1 %v2141_v63 }
 0x175   :  { %1606 = vmatprep.subr.bf16.mxu1 %v2149_v1 }
 0x1bf   :  { %v357_v2 = vpop.xlane.xlu0 %356  ;;  %v363_v5 = vpop.xlane.xlu1 %362 }
 0x1c0   :  { %v367_v3 = vadd.f32 1e-08, %v357_v2  ;;  %v369_v8 = vadd.f32 1e-08, %v363_v5 }
 0x1c2   :  { %2240 = vrsqrt.f32 %v367_v3 }
 0x1c3   :  { %v360_v4 = vpop.xlane.xlu0 %359  ;;  %v366_v7 = vpop.xlane.xlu1 %365 }
 0x1c4   :  { %v368_v6 = vadd.f32 1e-08, %v360_v4  ;;  %v370_v9 = vadd.f32 1e-08, %v366_v7 }
 0x1c6   :  { %2242 = vrsqrt.f32 %v368_v6 }
 0x1c7   :  { %2244 = vrsqrt.f32 %v369_v8 }
 0x1c8   :  { %2246 = vrsqrt.f32 %v370_v9 }
 0x1cf   :  { %v2241_v15 = vpop.eup %2240 }
 0x1d3   :  { %v2243_v20 = vpop.eup %2242 }
 0x1d4   :  { %v2245_v57 = vpop.eup %2244 }
 0x1d5   :  { %v2247_v62 = vpop.eup %2246 }
 0x1f1   :  { %v562_v12 = vpop.f32.mrf.mxu1  ;;  %v473_v13 = vpop.f32.mrf.mxu0 }
 0x1f2   :  { %v587_v16 = vmul.f32 %v2241_v15, %v562_v12  ;;  %v585_v18 = vmul.f32 %v2241_v15, %v473_v13  ;;  %v650_v12 = vld [vmem:[#allocation9 + $0x58] sm:$0xff] }
 0x1f3   :  { %v475_v21 = vpop.f32.mrf.mxu0  ;;  %v564_v24 = vpop.f32.mrf.mxu1 }
 0x1f4   :  { %v586_v25 = vmul.f32 %v2241_v15, %v475_v21  ;;  %v588_v27 = vmul.f32 %v2241_v15, %v564_v24  ;;  %v625_v31 = vadd.f32 %v2631_v17, %v587_v16  ;;  %v623_v32 = vadd.f32 %v2634_v19, %v585_v18  ;;  %v2144_v18 = vld [vmem:[#allocation10 + $0xe8] ss:$16 sps:$4 sm:$0xff]  }
 0x1f5   :  { %v568_v29 = vpop.f32.mrf.mxu1  ;;  %v479_v30 = vpop.f32.mrf.mxu0 }
 0x1f6   :  { %v591_v33 = vmul.f32 %v2243_v20, %v568_v29  ;;  %v589_v34 = vmul.f32 %v2243_v20, %v479_v30  ;;  %v624_v38 = vadd.f32 %v2637_v26, %v586_v25  ;;  %v626_v41 = vadd.f32 %v2639_v28, %v588_v27  ;;  %v651_v25 = vld [vmem:[#allocation9 + $0x60] sm:$0xff]  ;;  %v2147_v30 = vld [vmem:[#allocation10 + $0x2e8] ss:$16 sps:$4 sm:$0xff]  }
 0x1f7   :  { %v481_v22 = vpop.f32.mrf.mxu0  ;;  %v570_v35 = vpop.f32.mrf.mxu1  ;;  %v657_v53 = vmul.f32 %v641_v36, %v625_v31  ;;  %v655_v54 = vmul.f32 %v639_v37, %v623_v32  ;;  %v653_v36 = vld [vmem:[#allocation9 + $0x70] sm:$0xff] }
 0x1f8   :  { %v590_v39 = vmul.f32 %v2243_v20, %v481_v22  ;;  %v592_v40 = vmul.f32 %v2243_v20, %v570_v35  ;;  %v629_v42 = vadd.f32 %v2631_v17, %v591_v33  ;;  %v627_v43 = vadd.f32 %v2634_v19, %v589_v34  ;;  %v2152_v20 = vld [vmem:[#allocation10 + $0xcc] ss:$16 sps:$4 sm:$0xff]  }
 0x1f9   :  { %v485_v47 = vpop.f32.mrf.mxu0  ;;  %v574_v48 = vpop.f32.mrf.mxu1  ;;  %v656_v58 = vmul.f32 %v640_v23, %v624_v38  ;;  %v658_v63 = vmul.f32 %v642_v49, %v626_v41  ;;  %v652_v33 = vld [vmem:[#allocation9 + $0x68] sm:$0xff]  ;;  %v654_v34 = vld [vmem:[#allocation9 + $0x78] sm:$0xff]  ;;  %v647_v23 = vld [vmem:[#allocation9 + $0x40] sm:$0xff] }
 0x1fa   :  { %v628_v51 = vadd.f32 %v2637_v26, %v590_v39  ;;  %v630_v52 = vadd.f32 %v2639_v28, %v592_v40  ;;  %v659_v59 = vmul.f32 %v643_v44, %v627_v43  ;;  %v661_v0 = vmul.f32 %v645_v50, %v629_v42  ;;  %v2155_v22 = vld [vmem:[#allocation10 + $0x2cc] ss:$16 sps:$4 sm:$0xff]   ;;  %v2150_v42 = vld [vmem:[#allocation10 + $0xc8] ss:$16 sps:$4 sm:$0xff]   ;;  %v649_v43 = vld [vmem:[#allocation9 + $0x50] sm:$0xff] }
 0x1fb   :  { %v487_v55 = vpop.f32.mrf.mxu0  ;;  %v576_v56 = vpop.f32.mrf.mxu1  ;;  %v593_v5 = vmul.f32 %v2245_v57, %v485_v47  ;;  %v595_v6 = vmul.f32 %v2245_v57, %v574_v48  ;;  %v2161_v49 = vld [vmem:[#allocation10 + $0x2ac] ss:$16 sps:$4 sm:$0xff]  }
 0x1fc   :  { %v660_v60 = vmul.f32 %v644_v45, %v628_v51  ;;  %v662_v61 = vmul.f32 %v646_v46, %v630_v52  ;;  %v594_v1 = vmul.f32 %v2245_v57, %v487_v55  ;;  %v596_v2 = vmul.f32 %v2245_v57, %v576_v56  ;;  %v2156_v51 = vld [vmem:[#allocation10 + $0xa8] ss:$16 sps:$4 sm:$0xff]   ;;  %v2164_v55 = vld [vmem:[#allocation10 + $0x8c] ss:$16 sps:$4 sm:$0xff]  }
 0x1fd   :  { %v491_v3 = vpop.f32.mrf.mxu0  ;;  %v580_v4 = vpop.f32.mrf.mxu1  ;;  %v2651_v21 = vpack.c.bf16 %v659_v59, %v655_v54  ;;  %v2654_v31 = vpack.c.bf16 %v661_v0, %v657_v53  ;;  %v631_v35 = vadd.f32 %v2634_v19, %v593_v5  ;;  %v633_v39 = vadd.f32 %v2631_v17, %v595_v6  ;;  %v2159_v52 = vld [vmem:[#allocation10 + $0x2a8] ss:$16 sps:$4 sm:$0xff]   ;;  %v2167_v56 = vld [vmem:[#allocation10 + $0x28c] ss:$16 sps:$4 sm:$0xff]  }
 0x1fe   :  { %v597_v7 = vmul.f32 %v2247_v62, %v491_v3  ;;  %v599_v8 = vmul.f32 %v2247_v62, %v580_v4  ;;  %v632_v9 = vadd.f32 %v2637_v26, %v594_v1  ;;  %v634_v11 = vadd.f32 %v2639_v28, %v596_v2  ;;  %v2162_v57 = vld [vmem:[#allocation10 + $0x88] ss:$16 sps:$4 sm:$0xff]   ;;  %v2170_v59 = vld [vmem:[#allocation10 + $0x6c] ss:$16 sps:$4 sm:$0xff]  }
 0x1ff   :  { %v493_v13 = vpop.f32.mrf.mxu0  ;;  %v582_v14 = vpop.f32.mrf.mxu1  ;;  %v672_v15 = vpack.c.bf16 %v660_v60, %v656_v58  ;;  %v674_v16 = vpack.c.bf16 %v662_v61, %v658_v63  ;;  %v663_v47 = vmul.f32 %v647_v23, %v631_v35  ;;  %v665_v50 = vmul.f32 %v649_v43, %v633_v39  ;;  %v2165_v58 = vld [vmem:[#allocation10 + $0x288] ss:$16 sps:$4 sm:$0xff]   ;;  %v2173_v60 = vld [vmem:[#allocation10 + $0x26c] ss:$16 sps:$4 sm:$0xff]  }
 0x200   :  { %v635_v24 = vadd.f32 %v2634_v19, %v597_v7  ;;  %v598_v27 = vmul.f32 %v2247_v62, %v493_v13  ;;  %v600_v29 = vmul.f32 %v2247_v62, %v582_v14  ;;  %v637_v32 = vadd.f32 %v2631_v17, %v599_v8  ;;  %v2168_v61 = vld [vmem:[#allocation10 + $0x68] ss:$16 sps:$4 sm:$0xff]   ;;  %v2176_v63 = vld [vmem:[#allocation10 + $0x4c] ss:$16 sps:$4 sm:$0xff]  }
 0x201   :  { %1479 = vmatprep.mubr.bf16.mxu0 %v672_v15  ;;  %1532 = vmatprep.mubr.bf16.mxu1 %v674_v16  ;;  %v664_v40 = vmul.f32 %v648_v10, %v632_v9  ;;  %v666_v41 = vmul.f32 %v650_v12, %v634_v11  ;;  %v2171_v62 = vld [vmem:[#allocation10 + $0x268] ss:$16 sps:$4 sm:$0xff]   ;;  %v2179_v0 = vld [vmem:[#allocation10 + $0x24c] ss:$16 sps:$4 sm:$0xff]  }
 0x202   :  { %v636_v37 = vadd.f32 %v2637_v26, %v598_v27  ;;  %v638_v38 = vadd.f32 %v2639_v28, %v600_v29  ;;  %1480 = vmatmul.mubr.bf16.vlgmr.msra.gmra.mxu0 %v2651_v21  ;;  %1533 = vmatmul.mubr.bf16.vlgmr.msra.gmra.mxu1 %v2654_v31  ;;  %v667_v44 = vmul.f32 %v651_v25, %v635_v24  ;;  %v2153_v26 = vld [vmem:[#allocation10 + $0x2c8] ss:$16 sps:$4 sm:$0xff]   ;;  %v2158_v28 = vld [vmem:[#allocation10 + $0xac] ss:$16 sps:$4 sm:$0xff]  }
 0x203   :  { %1554 = vmatpush1.bf16.msra.mxu0 %v2144_v18  ;;  %1607 = vmatpush1.bf16.msra.mxu1 %v2147_v30  ;;  %v669_v46 = vmul.f32 %v653_v36, %v637_v32  ;;  %v2174_v1 = vld [vmem:[#allocation10 + $0x48] ss:$16 sps:$4 sm:$0xff]   ;;  %v2182_v3 = vld [vmem:[#allocation10 + $0x2c] ss:$16 sps:$4 sm:$0xff]  }
 0x204   :  { %v668_v45 = vmul.f32 %v652_v33, %v636_v37  ;;  %v670_v19 = vmul.f32 %v654_v34, %v638_v38  ;;  %1555 = vmatprep.subr.bf16.mxu0 %v2152_v20  ;;  %1608 = vmatprep.subr.bf16.mxu1 %v2155_v22  ;;  %v2668_v53 = vpack.c.bf16 %v667_v44, %v663_v47  ;;  %v2177_v2 = vld [vmem:[#allocation10 + $0x248] ss:$16 sps:$4 sm:$0xff]   ;;  %v2185_v4 = vld [vmem:[#allocation10 + $0x22c] ss:$16 sps:$4 sm:$0xff]  }
 0x205   :  { %v2671_v54 = vpack.c.bf16 %v669_v46, %v665_v50  ;;  %v2180_v5 = vld [vmem:[#allocation10 + $0x28] ss:$16 sps:$4 sm:$0xff]   ;;  %v2188_v7 = vld [vmem:[#allocation10 + $0xc] ss:$16 sps:$4 sm:$0xff]  }
 0x206   :  { %v2663_v48 = vpack.c.bf16 %v668_v45, %v664_v40  ;;  %v2665_v17 = vpack.c.bf16 %v670_v19, %v666_v41  ;;  %v2183_v6 = vld [vmem:[#allocation10 + $0x228] ss:$16 sps:$4 sm:$0xff]   ;;  %v2191_v8 = vld [vmem:[#allocation10 + $0x20c] ss:$16 sps:$4 sm:$0xff]  }
 0x207   :  { %1556 = vmatpush1.bf16.msra.mxu0 %v2150_v42  ;;  %1609 = vmatpush1.bf16.msra.mxu1 %v2153_v26  ;;  %v2186_v9 = vld [vmem:[#allocation10 + $0x8] ss:$16 sps:$4 sm:$0xff]   ;;  %v2194_v11 = vld [vmem:[#allocation10 + $0x1ec] ss:$16 sps:$4 sm:$0xff]  }
 0x208   :  { %1489 = vmatprep.mubr.bf16.mxu0 %v2663_v48  ;;  %1542 = vmatprep.mubr.bf16.mxu1 %v2665_v17  ;;  %v2189_v10 = vld [vmem:[#allocation10 + $0x208] ss:$16 sps:$4 sm:$0xff]   ;;  %v2197_v12 = vld [vmem:[#allocation10 + $0x3ec] ss:$16 sps:$4 sm:$0xff]  }
 0x209   :  { %1557 = vmatprep.subr.bf16.mxu0 %v2158_v28  ;;  %1610 = vmatprep.subr.bf16.mxu1 %v2161_v49  ;;  %v2192_v13 = vld [vmem:[#allocation10 + $0x1e8] ss:$16 sps:$4 sm:$0xff]   ;;  %v2206_v25 = vld [vmem:[#allocation10 + $0x1ac] ss:$16 sps:$4 sm:$0xff]   ;;  %v2434_v28 = vmov 0  }
 0x20a   :  { %1490 = vmatmul.mubr.bf16.gmra.mxu0 %v2668_v53  ;;  %1543 = vmatmul.mubr.bf16.gmra.mxu1 %v2671_v54  ;;  %v2195_v14 = vld [vmem:[#allocation10 + $0x3e8] ss:$16 sps:$4 sm:$0xff]   ;;  %v2209_v27 = vld [vmem:[#allocation10 + $0x3ac] ss:$16 sps:$4 sm:$0xff]  }
 0x20b   :  { %1558 = vmatpush1.bf16.msra.mxu0 %v2156_v51  ;;  %1611 = vmatpush1.bf16.msra.mxu1 %v2159_v52  ;;  %v2198_v18 = vld [vmem:[#allocation10 + $0x1c8] ss:$16 sps:$4 sm:$0xff]   ;;  %v2212_v20 = vld [vmem:[#allocation10 + $0x18c] ss:$16 sps:$4 sm:$0xff]  }
 0x20c   :  { %1585 = vmatprep.mubr.bf16.mxu0 %v672_v15  ;;  %1638 = vmatprep.mubr.bf16.mxu1 %v674_v16  ;;  %v2200_v15 = vld [vmem:[#allocation10 + $0x1cc] ss:$16 sps:$4 sm:$0xff]   ;;  %v2201_v24 = vld [vmem:[#allocation10 + $0x3c8] ss:$16 sps:$4 sm:$0xff]  }
 0x20d   :  { %1559 = vmatprep.subr.bf16.mxu0 %v2164_v55  ;;  %1612 = vmatprep.subr.bf16.mxu1 %v2167_v56  ;;  %v2203_v16 = vld [vmem:[#allocation10 + $0x3cc] ss:$16 sps:$4 sm:$0xff]   ;;  %v2204_v29 = vld [vmem:[#allocation10 + $0x1a8] ss:$16 sps:$4 sm:$0xff]  }
 0x20e   :  { %v2207_v30 = vld [vmem:[#allocation10 + $0x3a8] ss:$16 sps:$4 sm:$0xff]   ;;  %v2215_v32 = vld [vmem:[#allocation10 + $0x38c] ss:$16 sps:$4 sm:$0xff]   ;;  %2047 = vset.pattern.permute.xlu0 %v2434_v28 }
 0x20f   :  { %1560 = vmatpush1.bf16.msra.mxu0 %v2162_v57  ;;  %1613 = vmatpush1.bf16.msra.mxu1 %v2165_v58  ;;  %v2210_v33 = vld [vmem:[#allocation10 + $0x188] ss:$16 sps:$4 sm:$0xff]   ;;  %v2218_v22 = vld [vmem:[#allocation10 + $0x16c] ss:$16 sps:$4 sm:$0xff]  }
 0x210   :  { %1561 = vmatprep.subr.bf16.mxu0 %v2170_v59  ;;  %1614 = vmatprep.subr.bf16.mxu1 %v2173_v60  ;;  %v2213_v34 = vld [vmem:[#allocation10 + $0x388] ss:$16 sps:$4 sm:$0xff]   ;;  %v2221_v35 = vld [vmem:[#allocation10 + $0x36c] ss:$16 sps:$4 sm:$0xff]  }
 0x211   :  { %v2216_v36 = vld [vmem:[#allocation10 + $0x168] ss:$16 sps:$4 sm:$0xff]   ;;  %v2224_v38 = vld [vmem:[#allocation10 + $0x14c] ss:$16 sps:$4 sm:$0xff]  }
 0x212   :  { %v2219_v37 = vld [vmem:[#allocation10 + $0x368] ss:$16 sps:$4 sm:$0xff]   ;;  %v2227_v23 = vld [vmem:[#allocation10 + $0x34c] ss:$16 sps:$4 sm:$0xff]  }
 0x213   :  { %1562 = vmatpush1.bf16.msra.mxu0 %v2168_v61  ;;  %1615 = vmatpush1.bf16.msra.mxu1 %v2171_v62  ;;  %v2222_v39 = vld [vmem:[#allocation10 + $0x148] ss:$16 sps:$4 sm:$0xff]   ;;  %v2230_v41 = vld [vmem:[#allocation10 + $0x12c] ss:$16 sps:$4 sm:$0xff]  }
 0x214   :  { %1563 = vmatprep.subr.bf16.mxu0 %v2176_v63  ;;  %1616 = vmatprep.subr.bf16.mxu1 %v2179_v0  ;;  %v2225_v40 = vld [vmem:[#allocation10 + $0x348] ss:$16 sps:$4 sm:$0xff]   ;;  %v2233_v42 = vld [vmem:[#allocation10 + $0x32c] ss:$16 sps:$4 sm:$0xff]  }
 0x215   :  { %v2228_v43 = vld [vmem:[#allocation10 + $0x128] ss:$16 sps:$4 sm:$0xff]   ;;  %v2236_v45 = vld [vmem:[#allocation10 + $0x10c] ss:$16 sps:$4 sm:$0xff]  }
 0x216   :  { %v2231_v44 = vld [vmem:[#allocation10 + $0x328] ss:$16 sps:$4 sm:$0xff]   ;;  %v2239_v19 = vld [vmem:[#allocation10 + $0x30c] ss:$16 sps:$4 sm:$0xff]  }
 0x217   :  { %1564 = vmatpush1.bf16.msra.mxu0 %v2174_v1  ;;  %1617 = vmatpush1.bf16.msra.mxu1 %v2177_v2  ;;  %v2234_v26 = vld [vmem:[#allocation10 + $0x108] ss:$16 sps:$4 sm:$0xff]  }
 0x218   :  { %1565 = vmatprep.subr.bf16.mxu0 %v2182_v3  ;;  %1618 = vmatprep.subr.bf16.mxu1 %v2185_v4  ;;  %v2237_v46 = vld [vmem:[#allocation10 + $0x308] ss:$16 sps:$4 sm:$0xff]  }
 0x219   :  { %v1748_v47 = vld [vmem:[#allocation13] sm:$0x3f] }
 0x21a   :  { %1751 = vperm.xlu0 %2047, %v1748_v47  }
 0x21b   :  { %1566 = vmatpush1.bf16.msra.mxu0 %v2180_v5  ;;  %1619 = vmatpush1.bf16.msra.mxu1 %v2183_v6 }
 0x21c   :  { %1567 = vmatprep.subr.bf16.mxu0 %v2188_v7  ;;  %1620 = vmatprep.subr.bf16.mxu1 %v2191_v8 }
 0x21f   :  { %1568 = vmatpush1.bf16.msra.mxu0 %v2186_v9  ;;  %1621 = vmatpush1.bf16.msra.mxu1 %v2189_v10  ;;  %v2693_v10 = vpop.xlane.xlu1 %393 }
 0x220   :  { %1569 = vmatprep.subr.bf16.mxu0 %v2194_v11  ;;  %1622 = vmatprep.subr.bf16.mxu1 %v2197_v12 }
 0x223   :  { %1570 = vmatpush2.bf16.msra.mxu0 %v2192_v13  ;;  %1623 = vmatpush2.bf16.msra.mxu1 %v2195_v14 }
 0x224   :  { %1571 = vmatprep.subr.bf16.mxu0 %v2200_v15  ;;  %1624 = vmatprep.subr.bf16.mxu1 %v2203_v16  ;;  %v2698_v16 = vpop.xlane.xlu0 %390 }
 0x227   :  { %1572 = vmatpush2.bf16.msra.mxu0 %v2198_v18  ;;  %1625 = vmatpush2.bf16.msra.mxu1 %v2201_v24 }
 0x228   :  { %1573 = vmatprep.subr.bf16.mxu0 %v2206_v25  ;;  %1626 = vmatprep.subr.bf16.mxu1 %v2209_v27 }
 0x22b   :  { %1574 = vmatpush2.bf16.msra.mxu0 %v2204_v29  ;;  %1627 = vmatpush2.bf16.msra.mxu1 %v2207_v30  ;;  %v2706_v30 = vpop.xlane.xlu1 %387 }
 0x22c   :  { %1575 = vmatprep.subr.bf16.mxu0 %v2212_v20  ;;  %1628 = vmatprep.subr.bf16.mxu1 %v2215_v32 }
 0x22f   :  { %1576 = vmatpush2.bf16.msra.mxu0 %v2210_v33  ;;  %1629 = vmatpush2.bf16.msra.mxu1 %v2213_v34 }
 0x230   :  { %1577 = vmatprep.subr.bf16.mxu0 %v2218_v22  ;;  %1630 = vmatprep.subr.bf16.mxu1 %v2221_v35  ;;  %v2715_v35 = vpop.xlane.xlu0 %384 }
 0x233   :  { %1578 = vmatpush2.bf16.msra.mxu0 %v2216_v36  ;;  %1631 = vmatpush2.bf16.msra.mxu1 %v2219_v37 }
 0x234   :  { %1579 = vmatprep.subr.bf16.mxu0 %v2224_v38  ;;  %1632 = vmatprep.subr.bf16.mxu1 %v2227_v23 }
 0x237   :  { %1580 = vmatpush2.bf16.msra.mxu0 %v2222_v39  ;;  %1633 = vmatpush2.bf16.msra.mxu1 %v2225_v40 }
 0x238   :  { %1581 = vmatprep.subr.bf16.mxu0 %v2230_v41  ;;  %1634 = vmatprep.subr.bf16.mxu1 %v2233_v42 }
 0x23b   :  { %1582 = vmatpush2.bf16.msra.mxu0 %v2228_v43  ;;  %1635 = vmatpush2.bf16.msra.mxu1 %v2231_v44  ;;  %v2721_v43 = vld [vmem:[#allocation12] sm:$0x7] }
 0x23c   :  { %1583 = vmatprep.subr.bf16.mxu0 %v2236_v45  ;;  %1636 = vmatprep.subr.bf16.mxu1 %v2239_v19 }
 0x23f   :  { %1584 = vmatpush2.bf16.msra.mxu0 %v2234_v26  ;;  %1637 = vmatpush2.bf16.msra.mxu1 %v2237_v46 }
 0x242   :  { %1586 = vmatmul.mubr.bf16.vlgmr.msra.gmra.mxu0 %v2651_v21  ;;  %1639 = vmatmul.mubr.bf16.vlgmr.msra.gmra.mxu1 %v2654_v31 }
 0x243   :  { %1595 = vmatprep.mubr.bf16.mxu0 %v2663_v48  ;;  %1648 = vmatprep.mubr.bf16.mxu1 %v2665_v17 }
 0x24a   :  { %1596 = vmatmul.mubr.bf16.gmra.mxu0 %v2668_v53  ;;  %1649 = vmatmul.mubr.bf16.gmra.mxu1 %v2671_v54 }
 0x24b   :  { %1789 = vmatprep.mubr.bf16.mxu0 %v2434_v28  ;;  %1830 = vmatprep.mubr.bf16.mxu1 %v2434_v28 }
 0x2c2   :  { %v1481_v49 = vpop.f32.mrf.mxu0  ;;  %v1534_v50 = vpop.f32.mrf.mxu1 }
 0x2c3   :  { %v1535_v51 = vadd.f32 %v1534_v50, %v1481_v49 }
 0x2c4   :  { %v1483_v21 = vpop.f32.mrf.mxu0  ;;  %v1536_v52 = vpop.f32.mrf.mxu1 }
 0x2c5   :  { %vm1659_vm3 = vcmp.ge.f32.partialorder %v1535_v51, 0.0  ;;  %v1675_v31 = vmul.f32 0.2, %v1535_v51  ;;  %v1537_v48 = vadd.f32 %v1536_v52, %v1483_v21 }
 0x2c6   :  { %v1485_v55 = vpop.f32.mrf.mxu0  ;;  %v1538_v17 = vpop.f32.mrf.mxu1 }
 0x2c7   :  { %v1691_v56 = vsel %vm1659_vm3, %v1535_v51, %v1675_v31  ;;  %vm1660_vm4 = vcmp.ge.f32.partialorder %v1537_v48, 0.0  ;;  %v1676_v53 = vmul.f32 0.2, %v1537_v48  ;;  %v1539_v54 = vadd.f32 %v1538_v17, %v1485_v55 }
 0x2c8   :  { %v1487_v57 = vpop.f32.mrf.mxu0  ;;  %1707 = vst [vmem:[%s2785_s14] sm:$0xff] %v1691_v56  ;;  %v1540_v58 = vpop.f32.mrf.mxu1  ;;  %v1723_v41 = vmul.f32 %v1691_v56, %v2715_v35 }
 0x2c9   :  { %v1692_v59 = vsel %vm1660_vm4, %v1537_v48, %v1676_v53  ;;  %vm1663_vm5 = vcmp.ge.f32.partialorder %v1539_v54, 0.0  ;;  %v1679_v60 = vmul.f32 0.2, %v1539_v54  ;;  %v1541_v61 = vadd.f32 %v1540_v58, %v1487_v57 }
 0x2ca   :  { %v1491_v62 = vpop.f32.mrf.mxu0  ;;  %1708 = vst [vmem:[%s2785_s14 + $0x8] sm:$0xff] %v1692_v59  ;;  %v1544_v63 = vpop.f32.mrf.mxu1  ;;  %v1724_v38 = vmul.f32 %v1692_v59, %v2715_v35 }
 0x2cb   :  { %v1695_v0 = vsel %vm1663_vm5, %v1539_v54, %v1679_v60  ;;  %vm1664_vm6 = vcmp.ge.f32.partialorder %v1541_v61, 0.0  ;;  %v1680_v1 = vmul.f32 0.2, %v1541_v61  ;;  %v1545_v2 = vadd.f32 %v1544_v63, %v1491_v62 }
 0x2cc   :  { %v1493_v3 = vpop.f32.mrf.mxu0  ;;  %1711 = vst [vmem:[%s2785_s14 + $0x20] sm:$0xff] %v1695_v0  ;;  %v1546_v4 = vpop.f32.mrf.mxu1  ;;  %v1727_v23 = vmul.f32 %v1695_v0, %v2706_v30 }
 0x2cd   :  { %v1696_v5 = vsel %vm1664_vm6, %v1541_v61, %v1680_v1  ;;  %vm1667_vm7 = vcmp.ge.f32.partialorder %v1545_v2, 0.0  ;;  %v1683_v6 = vmul.f32 0.2, %v1545_v2  ;;  %v1547_v7 = vadd.f32 %v1546_v4, %v1493_v3 }
 0x2ce   :  { %v1495_v8 = vpop.f32.mrf.mxu0  ;;  %1712 = vst [vmem:[%s2785_s14 + $0x28] sm:$0xff] %v1696_v5  ;;  %v1548_v9 = vpop.f32.mrf.mxu1  ;;  %v1728_v22 = vmul.f32 %v1696_v5, %v2706_v30  ;;  %v1739_v42 = vpack.c.bf16 %v1727_v23, %v1723_v41 }
 0x2cf   :  { %v1699_v11 = vsel %vm1667_vm7, %v1545_v2, %v1683_v6  ;;  %vm1668_vm8 = vcmp.ge.f32.partialorder %v1547_v7, 0.0  ;;  %v1684_v12 = vmul.f32 0.2, %v1547_v7  ;;  %v1549_v13 = vadd.f32 %v1548_v9, %v1495_v8 }
 0x2d0   :  { %v1497_v14 = vpop.f32.mrf.mxu0  ;;  %1715 = vst [vmem:[%s2785_s14 + $0x40] sm:$0xff] %v1699_v11  ;;  %v1550_v15 = vpop.f32.mrf.mxu1  ;;  %v1731_v36 = vmul.f32 %v1699_v11, %v2698_v16  ;;  %v1740_v40 = vpack.c.bf16 %v1728_v22, %v1724_v38 }
 0x2d1   :  { %v1700_v18 = vsel %vm1668_vm8, %v1547_v7, %v1684_v12  ;;  %vm1671_vm9 = vcmp.ge.f32.partialorder %v1549_v13, 0.0  ;;  %v1687_v24 = vmul.f32 0.2, %v1549_v13  ;;  %v1551_v25 = vadd.f32 %v1550_v15, %v1497_v14 }
 0x2d2   :  { %1716 = vst [vmem:[%s2785_s14 + $0x48] sm:$0xff] %v1700_v18  ;;  %v1732_v33 = vmul.f32 %v1700_v18, %v2698_v16 }
 0x2d3   :  { %v1703_v27 = vsel %vm1671_vm9, %v1549_v13, %v1687_v24  ;;  %vm1672_vm10 = vcmp.ge.f32.partialorder %v1551_v25, 0.0  ;;  %v1688_v29 = vmul.f32 0.2, %v1551_v25 }
 0x2d4   :  { %1719 = vst [vmem:[%s2785_s14 + $0x60] sm:$0xff] %v1703_v27  ;;  %v1735_v20 = vmul.f32 %v1703_v27, %v2693_v10 }
 0x2d5   :  { %v1704_v32 = vsel %vm1672_vm10, %v1551_v25, %v1688_v29 }
 0x2d6   :  { %1720 = vst [vmem:[%s2785_s14 + $0x68] sm:$0xff] %v1704_v32  ;;  %v1736_v34 = vmul.f32 %v1704_v32, %v2693_v10  ;;  %v1743_v39 = vpack.c.bf16 %v1735_v20, %v1731_v36 }
 0x2d8   :  { %v1744_v37 = vpack.c.bf16 %v1736_v34, %v1732_v33 }
 0x2da   :  { %1769 = vmatprep.subr.bf16.mxu0 %v1744_v37 }
 0x2db   :  { %1770 = vmatpush1.bf16.msra.mxu0 %v1743_v39 }
 0x2dc   :  { %1771 = vmatprep.subr.bf16.mxu0 %v1740_v40 }
 0x2df   :  { %1772 = vmatpush1.bf16.msra.mxu0 %v1739_v42 }
 0x2e2   :  { %1996 = vmatmul.mubr.msk.bf16.vlgmr.msra.gmra.mxu0 %vm167_vm1, %v2721_v43 }
 0x302   :  { %v1587_v44 = vpop.f32.mrf.mxu0  ;;  %v1640_v45 = vpop.f32.mrf.mxu1 }
 0x303   :  { %v1641_v19 = vadd.f32 %v1640_v45, %v1587_v44 }
 0x304   :  { %v1589_v26 = vpop.f32.mrf.mxu0  ;;  %v1642_v46 = vpop.f32.mrf.mxu1 }
 0x305   :  { %vm1661_vm11 = vcmp.ge.f32.partialorder %v1641_v19, 0.0  ;;  %v1677_v28 = vmul.f32 0.2, %v1641_v19  ;;  %v1643_v47 = vadd.f32 %v1642_v46, %v1589_v26 }
 0x306   :  { %v1591_v49 = vpop.f32.mrf.mxu0  ;;  %v1644_v50 = vpop.f32.mrf.mxu1 }
 0x307   :  { %v1693_v51 = vsel %vm1661_vm11, %v1641_v19, %v1677_v28  ;;  %vm1662_vm12 = vcmp.ge.f32.partialorder %v1643_v47, 0.0  ;;  %v1678_v21 = vmul.f32 0.2, %v1643_v47  ;;  %v1645_v52 = vadd.f32 %v1644_v50, %v1591_v49 }
 0x308   :  { %v1593_v31 = vpop.f32.mrf.mxu0  ;;  %1709 = vst [vmem:[%s2785_s14 + $0x10] sm:$0xff] %v1693_v51  ;;  %v1646_v48 = vpop.f32.mrf.mxu1  ;;  %v1725_v22 = vmul.f32 %v1693_v51, %v2715_v35 }
 0x309   :  { %v1694_v55 = vsel %vm1662_vm12, %v1643_v47, %v1678_v21  ;;  %vm1665_vm13 = vcmp.ge.f32.partialorder %v1645_v52, 0.0  ;;  %v1681_v17 = vmul.f32 0.2, %v1645_v52  ;;  %v1647_v56 = vadd.f32 %v1646_v48, %v1593_v31 }
 0x30a   :  { %v1597_v53 = vpop.f32.mrf.mxu0  ;;  %1710 = vst [vmem:[%s2785_s14 + $0x18] sm:$0xff] %v1694_v55  ;;  %v1650_v54 = vpop.f32.mrf.mxu1  ;;  %v1726_v20 = vmul.f32 %v1694_v55, %v2715_v35 }
 0x30b   :  { %v1697_v57 = vsel %vm1665_vm13, %v1645_v52, %v1681_v17  ;;  %vm1666_vm14 = vcmp.ge.f32.partialorder %v1647_v56, 0.0  ;;  %v1682_v58 = vmul.f32 0.2, %v1647_v56  ;;  %v1651_v59 = vadd.f32 %v1650_v54, %v1597_v53 }
 0x30c   :  { %v1599_v60 = vpop.f32.mrf.mxu0  ;;  %1713 = vst [vmem:[%s2785_s14 + $0x30] sm:$0xff] %v1697_v57  ;;  %v1652_v61 = vpop.f32.mrf.mxu1  ;;  %v1729_v32 = vmul.f32 %v1697_v57, %v2706_v30 }
 0x30d   :  { %v1698_v62 = vsel %vm1666_vm14, %v1647_v56, %v1682_v58  ;;  %vm1669_vm15 = vcmp.ge.f32.partialorder %v1651_v59, 0.0  ;;  %v1685_v63 = vmul.f32 0.2, %v1651_v59  ;;  %v1653_v0 = vadd.f32 %v1652_v61, %v1599_v60 }
 0x30e   :  { %v1601_v1 = vpop.f32.mrf.mxu0  ;;  %1714 = vst [vmem:[%s2785_s14 + $0x38] sm:$0xff] %v1698_v62  ;;  %v1654_v2 = vpop.f32.mrf.mxu1  ;;  %v1730_v25 = vmul.f32 %v1698_v62, %v2706_v30  ;;  %v1741_v36 = vpack.c.bf16 %v1729_v32, %v1725_v22 }
 0x30f   :  { %v1701_v3 = vsel %vm1669_vm15, %v1651_v59, %v1685_v63  ;;  %vm1670_vm0 = vcmp.ge.f32.partialorder %v1653_v0, 0.0  ;;  %v1686_v4 = vmul.f32 0.2, %v1653_v0  ;;  %v1655_v5 = vadd.f32 %v1654_v2, %v1601_v1 }
 0x310   :  { %v1603_v6 = vpop.f32.mrf.mxu0  ;;  %1717 = vst [vmem:[%s2785_s14 + $0x50] sm:$0xff] %v1701_v3  ;;  %v1656_v7 = vpop.f32.mrf.mxu1  ;;  %v1733_v27 = vmul.f32 %v1701_v3, %v2698_v16  ;;  %v1742_v34 = vpack.c.bf16 %v1730_v25, %v1726_v20 }
 0x311   :  { %v1702_v8 = vsel %vm1670_vm0, %v1653_v0, %v1686_v4  ;;  %vm1673_vm2 = vcmp.ge.f32.partialorder %v1655_v5, 0.0  ;;  %v1689_v9 = vmul.f32 0.2, %v1655_v5  ;;  %v1657_v11 = vadd.f32 %v1656_v7, %v1603_v6 }
 0x312   :  { %1718 = vst [vmem:[%s2785_s14 + $0x58] sm:$0xff] %v1702_v8  ;;  %v1734_v18 = vmul.f32 %v1702_v8, %v2698_v16 }
 0x313   :  { %v1705_v12 = vsel %vm1673_vm2, %v1655_v5, %v1689_v9  ;;  %vm1674_vm3 = vcmp.ge.f32.partialorder %v1657_v11, 0.0  ;;  %v1690_v13 = vmul.f32 0.2, %v1657_v11 }
 0x314   :  { %1721 = vst [vmem:[%s2785_s14 + $0x70] sm:$0xff] %v1705_v12  ;;  %v1737_v14 = vmul.f32 %v1705_v12, %v2693_v10 }
 0x315   :  { %v1706_v15 = vsel %vm1674_vm3, %v1657_v11, %v1690_v13 }
 0x316   :  { %1722 = vst [vmem:[%s2785_s14 + $0x78] sm:$0xff] %v1706_v15  ;;  %v1738_v24 = vmul.f32 %v1706_v15, %v2693_v10  ;;  %v1745_v33 = vpack.c.bf16 %v1737_v14, %v1733_v27  ;;  %v1752_v10 = vpop.permute.xlu0 %1751 }
 0x318   :  { %v1746_v29 = vpack.c.bf16 %v1738_v24, %v1734_v18 }
 0x31a   :  { %1810 = vmatprep.subr.bf16.mxu1 %v1746_v29 }
 0x31b   :  { %1811 = vmatpush1.bf16.msra.mxu1 %v1745_v33 }
 0x31c   :  { %1812 = vmatprep.subr.bf16.mxu1 %v1742_v34 }
 0x31f   :  { %1813 = vmatpush1.bf16.msra.mxu1 %v1741_v36 }
 0x322   :  { %1997 = vmatmul.mubr.msk.bf16.vlgmr.msra.gmra.mxu1 %vm167_vm1, %v2721_v43 }
 0x3a2   :  { %v1791_v37 = vpop.f32.mrf.mxu0 }
 0x3a3   :  { %v1792_v16 = vadd.f32 %v1791_v37, %v1752_v10 }
 0x3a4   :  { %v1793_v38 = vpop.f32.mrf.mxu0 }
 0x3a5   :  { %v1794_v23 = vadd.f32 %v1793_v38, %v1752_v10  ;;  %1839 = vst [vmem:[%s2786_s15] sm:$0x3f] %v1792_v16 }
 0x3a6   :  { %v1795_v30 = vpop.f32.mrf.mxu0 }
 0x3a7   :  { %1840 = vst [vmem:[%s2786_s15 + $0x8] sm:$0x3f] %v1794_v23 }
 0x3a8   :  { %v1796_v35 = vpop.f32.mrf.mxu0 }
 0x3e2   :  { %v1832_v39 = vpop.f32.mrf.mxu1 }
 0x3e3   :  { %v1833_v40 = vadd.f32 %v1832_v39, %v1752_v10 }
 0x3e4   :  { %v1834_v41 = vpop.f32.mrf.mxu1 }
 0x3e5   :  { %v1835_v42 = vadd.f32 %v1834_v41, %v1752_v10  ;;  %1841 = vst [vmem:[%s2786_s15 + $0x10] sm:$0x3f] %v1833_v40 }
 0x3e6   :  { %v1836_v43 = vpop.f32.mrf.mxu1 }
 0x3e7   :  { %1842 = vst [vmem:[%s2786_s15 + $0x18] sm:$0x3f] %v1835_v42 }
 0x3e8   :  { %v1837_v44 = vpop.f32.mrf.mxu1 }
 0x3e9   :  { %1851 = vsyncpa [#allocation3], 1 }
 0x3ea   :  { %1852 = vsyncpa [#allocation5], 1 }
 0x3eb   :  { %1853 = vsyncpa [#allocation8], 1 }
 0x3ec   :  { %1854 = vsyncpa [#allocation11], 1 }
 0x3ed   :  { %1855 = vsyncpa [#allocation14], 1 }

</bundles_post_ra>
